<compile_context>
chip_gen: v5e
topology: v5e:2x2
jax: 0.10.0
libtpu: 0.0.40
codegen_flags: <defaults>
</compile_context>

<pallas_src>
import functools

import numpy as np
import jax
import jax.numpy as jnp
from jax.experimental import pallas as pl
from jax.experimental.pallas import tpu as pltpu


def _decode_kernel(*refs, scale_meta, num_anchors):
    """refs = [x_0, grid_0, mul_0, x_1, grid_1, mul_1, ..., out].

    x_s   : (A, C, hw_s)  raw conv output for one batch element (channel-major)
    grid_s: (2, hw_s)     row 0 = gx, row 1 = gy
    mul_s : (A, 4, 1)     [1/w, 1/h, anchor_w/in_w, anchor_h/in_h]
    out   : (total_boxes, C)  final (boxes, channels) layout, all scales fused
    """
    A = num_anchors
    o_ref = refs[3 * len(scale_meta)]
    for s, (hw, off) in enumerate(scale_meta):
        x_ref = refs[3 * s]
        g_ref = refs[3 * s + 1]
        m_ref = refs[3 * s + 2]
        g = g_ref[...]                                     # (2, hw)
        m = m_ref[...]                                     # (A, 4, 1)

        # Whole-block compute, exactly ONE transcendental per element.
        xy = (jax.nn.sigmoid(x_ref[:, 0:2, :].astype(jnp.float32))
              + g[None]) * m[:, 0:2, :]                    # (A, 2, hw)  bx, by
        wh = (jnp.exp(x_ref[:, 2:4, :].astype(jnp.float32))
              * m[:, 2:4, :])                              # (A, 2, hw)  bw, bh
        pc = jax.nn.sigmoid(x_ref[:, 4:, :].astype(jnp.float32))  # obj + cls

        # Layout-only epilogue per anchor: stack channels back together,
        # (C, hw) -> (hw, C) on the XLU, store at the scale's static row
        # offset -> no XLA epilogue transpose/concat (no extra HBM pass).
        for a in range(A):
            dec = jnp.concatenate([xy[a], wh[a], pc[a]], axis=0)  # (C, hw)
            o_ref[pl.ds(off + a * hw, hw), :] = dec.T              # (hw, C)


@functools.partial(jax.jit, static_argnums=(2, 3, 4))
def yolov3_eval_decoder(xs, anchors, anchor_masks, in_size, num_classes):
    """Full YOLOv3EvalDecoder.forward: 3 NCHW maps -> (n, sum A*h*w, 5+nc)."""
    in_h, in_w = in_size
    A = len(anchor_masks[0])
    C = 5 + num_classes
    n = xs[0].shape[0]

    args, in_specs, scale_meta = [], [], []
    off = 0
    for x, mask in zip(xs, anchor_masks):
        nb, cin, h, w = x.shape
        assert nb == n and cin == A * C
        hw = h * w
        xr = x.reshape(n, A, C, hw)            # free row-major view of NCHW

        # Grid offsets as a tiny resident slab: row 0 = gx, row 1 = gy.
        g = np.zeros((2, hw), np.float32)
        g[0] = np.tile(np.arange(w, dtype=np.float32), h)
        g[1] = np.repeat(np.arange(h, dtype=np.float32), w)
        g = jnp.asarray(g)

        # Per-(anchor, channel) multipliers for the 4 bbox rows.
        anc = anchors[np.asarray(mask, np.int32), :]        # (A, 2)
        m = jnp.concatenate(
            [jnp.full((A, 1), 1.0 / w, jnp.float32),
             jnp.full((A, 1), 1.0 / h, jnp.float32),
             (anc[:, 0:1] / in_w).astype(jnp.float32),
             (anc[:, 1:2] / in_h).astype(jnp.float32)], axis=1)[:, :, None]

        args += [xr, g, m]
        in_specs += [
            pl.BlockSpec((None, A, C, hw), lambda i: (i, 0, 0, 0)),
            pl.BlockSpec((2, hw), lambda i: (0, 0)),        # resident
            pl.BlockSpec((A, 4, 1), lambda i: (0, 0, 0)),   # resident
        ]
        scale_meta.append((hw, off))
        off += A * hw

    total_boxes = off
    kernel = functools.partial(_decode_kernel, scale_meta=tuple(scale_meta),
                               num_anchors=A)
    out = pl.pallas_call(
        kernel,
        out_shape=jax.ShapeDtypeStruct((n, total_boxes, C), jnp.float32),
        grid=(n,),
        in_specs=in_specs,
        out_specs=pl.BlockSpec((None, total_boxes, C), lambda i: (i, 0, 0)),
        compiler_params=pltpu.CompilerParams(
            dimension_semantics=("parallel",),
            vmem_limit_bytes=48 * 1024 * 1024),
    )(*args)
    return out


def reference_decoder(xs, anchors, anchor_masks, in_size, num_classes):
    """Pure-JAX mirror of the PyTorch module (for validation)."""
    in_h, in_w = in_size
    outs = []
    for x, mask in zip(xs, anchor_masks):
        n, cin, h, w = x.shape
        A = len(mask)
        C = 5 + num_classes
        xr = x.reshape(n, A, C, h, w).transpose(0, 1, 3, 4, 2)  # (n,A,h,w,C)
        sig = jax.nn.sigmoid(xr)
        gx = jnp.arange(w, dtype=jnp.float32).reshape(1, 1, 1, w)
        gy = jnp.arange(h, dtype=jnp.float32).reshape(1, 1, h, 1)
        bx = (sig[..., 0] + gx) / w
        by = (sig[..., 1] + gy) / h
        aw = anchors[jnp.array(mask), 0].reshape(1, A, 1, 1)
        ah = anchors[jnp.array(mask), 1].reshape(1, A, 1, 1)
        bw = jnp.exp(xr[..., 2]) * aw / in_w
        bh = jnp.exp(xr[..., 3]) * ah / in_h
        bbox = jnp.stack([bx, by, bw, bh], axis=-1).reshape(n, -1, 4)
        obj = sig[..., 4].reshape(n, -1, 1)
        cls = sig[..., 5:].reshape(n, -1, num_classes)
        outs.append(jnp.concatenate([bbox, obj, cls], axis=-1))
    return jnp.concatenate(outs, axis=1)


if __name__ == "__main__":
    # Small, deterministic config.
    batch = 2
    num_classes = 3                       # C = 5 + 3 = 8 channels per anchor
    in_size = (128, 128)                  # (height, width) of network input
    anchors = jnp.array(
        [(10., 13.), (16., 30.), (33., 23.),
         (30., 61.), (62., 45.), (59., 119.),
         (116., 90.), (156., 198.), (373., 326.)], dtype=jnp.float32)
    anchor_masks = ((6, 7, 8), (3, 4, 5), (0, 1, 2))
    # Three scales (coarse -> fine), NCHW with C = 3 * (5 + num_classes) = 24.
    spatial = (4, 8, 16)

    key = jax.random.PRNGKey(0)
    keys = jax.random.split(key, len(spatial))
    xs = [
        jax.random.normal(k, (batch, 3 * (5 + num_classes), s, s), jnp.float32)
        for k, s in zip(keys, spatial)
    ]

    out = yolov3_eval_decoder(xs, anchors, anchor_masks, in_size, num_classes)
    out = jax.block_until_ready(out)

    ref = reference_decoder(xs, anchors, anchor_masks, in_size, num_classes)
    ref = jax.block_until_ready(ref)

    expected_boxes = sum(3 * s * s for s in spatial)
    assert out.shape == (batch, expected_boxes, 5 + num_classes), out.shape
    assert jnp.allclose(out, ref, rtol=1e-5, atol=1e-5), float(
        jnp.max(jnp.abs(out - ref)))

    print("KERNEL_OK")
</pallas_src>

<mosaic_0001>
module attributes {stable_mosaic.version = 11 : i64} {
  func.func @_decode_kernel(%arg0: i32, %arg1: memref<1x3x8x16xf32, #tpu.memory_space<vmem>>, %arg2: memref<2x16xf32, #tpu.memory_space<vmem>>, %arg3: memref<3x4x1xf32, #tpu.memory_space<vmem>>, %arg4: memref<1x3x8x64xf32, #tpu.memory_space<vmem>>, %arg5: memref<2x64xf32, #tpu.memory_space<vmem>>, %arg6: memref<3x4x1xf32, #tpu.memory_space<vmem>>, %arg7: memref<1x3x8x256xf32, #tpu.memory_space<vmem>>, %arg8: memref<2x256xf32, #tpu.memory_space<vmem>>, %arg9: memref<3x4x1xf32, #tpu.memory_space<vmem>>, %arg10: memref<1x1008x8xf32, #tpu.memory_space<vmem>>) attributes {dimension_semantics = [#tpu.dimension_semantics<parallel>], iteration_bounds = array<i64: 2>, scalar_prefetch = 0 : i64, scratch_operands = 0 : i64, tpu.core_type = #tpu.core_type<tc>, window_params = [{transform_indices = @transform_0, window_bounds = array<i64: 1, 3, 8, 16>}, {pipeline_mode = #tpu.pipeline_mode<synchronous>, transform_indices = @transform_1, window_bounds = array<i64: 2, 16>}, {pipeline_mode = #tpu.pipeline_mode<synchronous>, transform_indices = @transform_2, window_bounds = array<i64: 3, 4, 1>}, {transform_indices = @transform_3, window_bounds = array<i64: 1, 3, 8, 64>}, {pipeline_mode = #tpu.pipeline_mode<synchronous>, transform_indices = @transform_4, window_bounds = array<i64: 2, 64>}, {pipeline_mode = #tpu.pipeline_mode<synchronous>, transform_indices = @transform_5, window_bounds = array<i64: 3, 4, 1>}, {transform_indices = @transform_6, window_bounds = array<i64: 1, 3, 8, 256>}, {pipeline_mode = #tpu.pipeline_mode<synchronous>, transform_indices = @transform_7, window_bounds = array<i64: 2, 256>}, {pipeline_mode = #tpu.pipeline_mode<synchronous>, transform_indices = @transform_8, window_bounds = array<i64: 3, 4, 1>}, {transform_indices = @transform_9, window_bounds = array<i64: 1, 1008, 8>}]} {
    %c0 = arith.constant 0 : index
    %c0_0 = arith.constant 0 : index
    %0 = vector.load %arg2[%c0, %c0_0] : memref<2x16xf32, #tpu.memory_space<vmem>>, vector<2x16xf32>
    %c0_1 = arith.constant 0 : index
    %c0_2 = arith.constant 0 : index
    %c0_3 = arith.constant 0 : index
    %1 = vector.load %arg3[%c0_1, %c0_2, %c0_3] : memref<3x4x1xf32, #tpu.memory_space<vmem>>, vector<3x4x1xf32>
    %c0_4 = arith.constant 0 : index
    %c0_5 = arith.constant 0 : index
    %c0_6 = arith.constant 0 : index
    %c0_7 = arith.constant 0 : index
    %2 = vector.load %arg1[%c0_4, %c0_5, %c0_6, %c0_7] : memref<1x3x8x16xf32, #tpu.memory_space<vmem>>, vector<1x3x2x16xf32>
    %3 = vector.shape_cast %2 : vector<1x3x2x16xf32> to vector<3x2x16xf32>
    %4 = arith.negf %3 : vector<3x2x16xf32>
    %5 = math.exp %4 : vector<3x2x16xf32>
    %cst = arith.constant 1.000000e+00 : f32
    %6 = vector.broadcast %cst : f32 to vector<3x2x16xf32>
    %7 = arith.addf %6, %5 : vector<3x2x16xf32>
    %8 = arith.divf %6, %7 : vector<3x2x16xf32>
    %9 = vector.shape_cast %0 : vector<2x16xf32> to vector<1x2x16xf32>
    %10 = vector.broadcast %9 : vector<1x2x16xf32> to vector<3x2x16xf32>
    %11 = arith.addf %8, %10 : vector<3x2x16xf32>
    %12 = vector.extract_strided_slice %1 {offsets = [0, 0, 0], sizes = [3, 2, 1], strides = [1, 1, 1]} : vector<3x4x1xf32> to vector<3x2x1xf32>
    %13 = vector.broadcast %12 : vector<3x2x1xf32> to vector<3x2x16xf32>
    %14 = arith.mulf %11, %13 : vector<3x2x16xf32>
    %c0_8 = arith.constant 0 : index
    %c0_9 = arith.constant 0 : index
    %c2 = arith.constant 2 : index
    %c0_10 = arith.constant 0 : index
    %15 = vector.load %arg1[%c0_8, %c0_9, %c2, %c0_10] : memref<1x3x8x16xf32, #tpu.memory_space<vmem>>, vector<1x3x2x16xf32>
    %16 = vector.shape_cast %15 : vector<1x3x2x16xf32> to vector<3x2x16xf32>
    %17 = math.exp %16 : vector<3x2x16xf32>
    %18 = vector.extract_strided_slice %1 {offsets = [0, 2, 0], sizes = [3, 2, 1], strides = [1, 1, 1]} : vector<3x4x1xf32> to vector<3x2x1xf32>
    %19 = vector.broadcast %18 : vector<3x2x1xf32> to vector<3x2x16xf32>
    %20 = arith.mulf %17, %19 : vector<3x2x16xf32>
    %c0_11 = arith.constant 0 : index
    %c0_12 = arith.constant 0 : index
    %c4 = arith.constant 4 : index
    %c0_13 = arith.constant 0 : index
    %21 = vector.load %arg1[%c0_11, %c0_12, %c4, %c0_13] : memref<1x3x8x16xf32, #tpu.memory_space<vmem>>, vector<1x3x4x16xf32>
    %22 = vector.shape_cast %21 : vector<1x3x4x16xf32> to vector<3x4x16xf32>
    %23 = arith.negf %22 : vector<3x4x16xf32>
    %24 = math.exp %23 : vector<3x4x16xf32>
    %cst_14 = arith.constant 1.000000e+00 : f32
    %25 = vector.broadcast %cst_14 : f32 to vector<3x4x16xf32>
    %26 = arith.addf %25, %24 : vector<3x4x16xf32>
    %27 = arith.divf %25, %26 : vector<3x4x16xf32>
    %28 = vector.extract_strided_slice %14 {offsets = [0, 0, 0], sizes = [1, 2, 16], strides = [1, 1, 1]} : vector<3x2x16xf32> to vector<1x2x16xf32>
    %29 = vector.shape_cast %28 : vector<1x2x16xf32> to vector<2x16xf32>
    %30 = vector.extract_strided_slice %20 {offsets = [0, 0, 0], sizes = [1, 2, 16], strides = [1, 1, 1]} : vector<3x2x16xf32> to vector<1x2x16xf32>
    %31 = vector.shape_cast %30 : vector<1x2x16xf32> to vector<2x16xf32>
    %32 = vector.extract_strided_slice %27 {offsets = [0, 0, 0], sizes = [1, 4, 16], strides = [1, 1, 1]} : vector<3x4x16xf32> to vector<1x4x16xf32>
    %33 = vector.shape_cast %32 : vector<1x4x16xf32> to vector<4x16xf32>
    %34 = tpu.concatenate %29, %31, %33 in 0 : vector<2x16xf32>, vector<2x16xf32>, vector<4x16xf32> -> vector<8x16xf32>
    %35 = tpu.transpose %34, [1, 0] : vector<8x16xf32> -> vector<16x8xf32>
    %c0_15 = arith.constant 0 : index
    %c0_16 = arith.constant 0 : index
    %c0_17 = arith.constant 0 : index
    %36 = vector.load %arg10[%c0_15, %c0_16, %c0_17] : memref<1x1008x8xf32, #tpu.memory_space<vmem>>, vector<1x16x8xf32>
    %37 = vector.shape_cast %36 : vector<1x16x8xf32> to vector<16x8xf32>
    %38 = vector.shape_cast %35 : vector<16x8xf32> to vector<1x16x8xf32>
    tpu.vector_store %arg10[%c0_15, %c0_16, %c0_17], %38 {strides = array<i32>} : memref<1x1008x8xf32, #tpu.memory_space<vmem>>, vector<1x16x8xf32>,
    %39 = vector.extract_strided_slice %14 {offsets = [1, 0, 0], sizes = [1, 2, 16], strides = [1, 1, 1]} : vector<3x2x16xf32> to vector<1x2x16xf32>
    %40 = vector.shape_cast %39 : vector<1x2x16xf32> to vector<2x16xf32>
    %41 = vector.extract_strided_slice %20 {offsets = [1, 0, 0], sizes = [1, 2, 16], strides = [1, 1, 1]} : vector<3x2x16xf32> to vector<1x2x16xf32>
    %42 = vector.shape_cast %41 : vector<1x2x16xf32> to vector<2x16xf32>
    %43 = vector.extract_strided_slice %27 {offsets = [1, 0, 0], sizes = [1, 4, 16], strides = [1, 1, 1]} : vector<3x4x16xf32> to vector<1x4x16xf32>
    %44 = vector.shape_cast %43 : vector<1x4x16xf32> to vector<4x16xf32>
    %45 = tpu.concatenate %40, %42, %44 in 0 : vector<2x16xf32>, vector<2x16xf32>, vector<4x16xf32> -> vector<8x16xf32>
    %46 = tpu.transpose %45, [1, 0] : vector<8x16xf32> -> vector<16x8xf32>
    %c0_18 = arith.constant 0 : index
    %c16 = arith.constant 16 : index
    %c0_19 = arith.constant 0 : index
    %47 = vector.load %arg10[%c0_18, %c16, %c0_19] : memref<1x1008x8xf32, #tpu.memory_space<vmem>>, vector<1x16x8xf32>
    %48 = vector.shape_cast %47 : vector<1x16x8xf32> to vector<16x8xf32>
    %49 = vector.shape_cast %46 : vector<16x8xf32> to vector<1x16x8xf32>
    tpu.vector_store %arg10[%c0_18, %c16, %c0_19], %49 {strides = array<i32>} : memref<1x1008x8xf32, #tpu.memory_space<vmem>>, vector<1x16x8xf32>,
    %50 = vector.extract_strided_slice %14 {offsets = [2, 0, 0], sizes = [1, 2, 16], strides = [1, 1, 1]} : vector<3x2x16xf32> to vector<1x2x16xf32>
    %51 = vector.shape_cast %50 : vector<1x2x16xf32> to vector<2x16xf32>
    %52 = vector.extract_strided_slice %20 {offsets = [2, 0, 0], sizes = [1, 2, 16], strides = [1, 1, 1]} : vector<3x2x16xf32> to vector<1x2x16xf32>
    %53 = vector.shape_cast %52 : vector<1x2x16xf32> to vector<2x16xf32>
    %54 = vector.extract_strided_slice %27 {offsets = [2, 0, 0], sizes = [1, 4, 16], strides = [1, 1, 1]} : vector<3x4x16xf32> to vector<1x4x16xf32>
    %55 = vector.shape_cast %54 : vector<1x4x16xf32> to vector<4x16xf32>
    %56 = tpu.concatenate %51, %53, %55 in 0 : vector<2x16xf32>, vector<2x16xf32>, vector<4x16xf32> -> vector<8x16xf32>
    %57 = tpu.transpose %56, [1, 0] : vector<8x16xf32> -> vector<16x8xf32>
    %c0_20 = arith.constant 0 : index
    %c32 = arith.constant 32 : index
    %c0_21 = arith.constant 0 : index
    %58 = vector.load %arg10[%c0_20, %c32, %c0_21] : memref<1x1008x8xf32, #tpu.memory_space<vmem>>, vector<1x16x8xf32>
    %59 = vector.shape_cast %58 : vector<1x16x8xf32> to vector<16x8xf32>
    %60 = vector.shape_cast %57 : vector<16x8xf32> to vector<1x16x8xf32>
    tpu.vector_store %arg10[%c0_20, %c32, %c0_21], %60 {strides = array<i32>} : memref<1x1008x8xf32, #tpu.memory_space<vmem>>, vector<1x16x8xf32>,
    %c0_22 = arith.constant 0 : index
    %c0_23 = arith.constant 0 : index
    %61 = vector.load %arg5[%c0_22, %c0_23] : memref<2x64xf32, #tpu.memory_space<vmem>>, vector<2x64xf32>
    %c0_24 = arith.constant 0 : index
    %c0_25 = arith.constant 0 : index
    %c0_26 = arith.constant 0 : index
    %62 = vector.load %arg6[%c0_24, %c0_25, %c0_26] : memref<3x4x1xf32, #tpu.memory_space<vmem>>, vector<3x4x1xf32>
    %c0_27 = arith.constant 0 : index
    %c0_28 = arith.constant 0 : index
    %c0_29 = arith.constant 0 : index
    %c0_30 = arith.constant 0 : index
    %63 = vector.load %arg4[%c0_27, %c0_28, %c0_29, %c0_30] : memref<1x3x8x64xf32, #tpu.memory_space<vmem>>, vector<1x3x2x64xf32>
    %64 = vector.shape_cast %63 : vector<1x3x2x64xf32> to vector<3x2x64xf32>
    %65 = arith.negf %64 : vector<3x2x64xf32>
    %66 = math.exp %65 : vector<3x2x64xf32>
    %cst_31 = arith.constant 1.000000e+00 : f32
    %67 = vector.broadcast %cst_31 : f32 to vector<3x2x64xf32>
    %68 = arith.addf %67, %66 : vector<3x2x64xf32>
    %69 = arith.divf %67, %68 : vector<3x2x64xf32>
    %70 = vector.shape_cast %61 : vector<2x64xf32> to vector<1x2x64xf32>
    %71 = vector.broadcast %70 : vector<1x2x64xf32> to vector<3x2x64xf32>
    %72 = arith.addf %69, %71 : vector<3x2x64xf32>
    %73 = vector.extract_strided_slice %62 {offsets = [0, 0, 0], sizes = [3, 2, 1], strides = [1, 1, 1]} : vector<3x4x1xf32> to vector<3x2x1xf32>
    %74 = vector.broadcast %73 : vector<3x2x1xf32> to vector<3x2x64xf32>
    %75 = arith.mulf %72, %74 : vector<3x2x64xf32>
    %c0_32 = arith.constant 0 : index
    %c0_33 = arith.constant 0 : index
    %c2_34 = arith.constant 2 : index
    %c0_35 = arith.constant 0 : index
    %76 = vector.load %arg4[%c0_32, %c0_33, %c2_34, %c0_35] : memref<1x3x8x64xf32, #tpu.memory_space<vmem>>, vector<1x3x2x64xf32>
    %77 = vector.shape_cast %76 : vector<1x3x2x64xf32> to vector<3x2x64xf32>
    %78 = math.exp %77 : vector<3x2x64xf32>
    %79 = vector.extract_strided_slice %62 {offsets = [0, 2, 0], sizes = [3, 2, 1], strides = [1, 1, 1]} : vector<3x4x1xf32> to vector<3x2x1xf32>
    %80 = vector.broadcast %79 : vector<3x2x1xf32> to vector<3x2x64xf32>
    %81 = arith.mulf %78, %80 : vector<3x2x64xf32>
    %c0_36 = arith.constant 0 : index
    %c0_37 = arith.constant 0 : index
    %c4_38 = arith.constant 4 : index
    %c0_39 = arith.constant 0 : index
    %82 = vector.load %arg4[%c0_36, %c0_37, %c4_38, %c0_39] : memref<1x3x8x64xf32, #tpu.memory_space<vmem>>, vector<1x3x4x64xf32>
    %83 = vector.shape_cast %82 : vector<1x3x4x64xf32> to vector<3x4x64xf32>
    %84 = arith.negf %83 : vector<3x4x64xf32>
    %85 = math.exp %84 : vector<3x4x64xf32>
    %cst_40 = arith.constant 1.000000e+00 : f32
    %86 = vector.broadcast %cst_40 : f32 to vector<3x4x64xf32>
    %87 = arith.addf %86, %85 : vector<3x4x64xf32>
    %88 = arith.divf %86, %87 : vector<3x4x64xf32>
    %89 = vector.extract_strided_slice %75 {offsets = [0, 0, 0], sizes = [1, 2, 64], strides = [1, 1, 1]} : vector<3x2x64xf32> to vector<1x2x64xf32>
    %90 = vector.shape_cast %89 : vector<1x2x64xf32> to vector<2x64xf32>
    %91 = vector.extract_strided_slice %81 {offsets = [0, 0, 0], sizes = [1, 2, 64], strides = [1, 1, 1]} : vector<3x2x64xf32> to vector<1x2x64xf32>
    %92 = vector.shape_cast %91 : vector<1x2x64xf32> to vector<2x64xf32>
    %93 = vector.extract_strided_slice %88 {offsets = [0, 0, 0], sizes = [1, 4, 64], strides = [1, 1, 1]} : vector<3x4x64xf32> to vector<1x4x64xf32>
    %94 = vector.shape_cast %93 : vector<1x4x64xf32> to vector<4x64xf32>
    %95 = tpu.concatenate %90, %92, %94 in 0 : vector<2x64xf32>, vector<2x64xf32>, vector<4x64xf32> -> vector<8x64xf32>
    %96 = tpu.transpose %95, [1, 0] : vector<8x64xf32> -> vector<64x8xf32>
    %c0_41 = arith.constant 0 : index
    %c48 = arith.constant 48 : index
    %c0_42 = arith.constant 0 : index
    %97 = vector.load %arg10[%c0_41, %c48, %c0_42] : memref<1x1008x8xf32, #tpu.memory_space<vmem>>, vector<1x64x8xf32>
    %98 = vector.shape_cast %97 : vector<1x64x8xf32> to vector<64x8xf32>
    %99 = vector.shape_cast %96 : vector<64x8xf32> to vector<1x64x8xf32>
    tpu.vector_store %arg10[%c0_41, %c48, %c0_42], %99 {strides = array<i32>} : memref<1x1008x8xf32, #tpu.memory_space<vmem>>, vector<1x64x8xf32>,
    %100 = vector.extract_strided_slice %75 {offsets = [1, 0, 0], sizes = [1, 2, 64], strides = [1, 1, 1]} : vector<3x2x64xf32> to vector<1x2x64xf32>
    %101 = vector.shape_cast %100 : vector<1x2x64xf32> to vector<2x64xf32>
    %102 = vector.extract_strided_slice %81 {offsets = [1, 0, 0], sizes = [1, 2, 64], strides = [1, 1, 1]} : vector<3x2x64xf32> to vector<1x2x64xf32>
    %103 = vector.shape_cast %102 : vector<1x2x64xf32> to vector<2x64xf32>
    %104 = vector.extract_strided_slice %88 {offsets = [1, 0, 0], sizes = [1, 4, 64], strides = [1, 1, 1]} : vector<3x4x64xf32> to vector<1x4x64xf32>
    %105 = vector.shape_cast %104 : vector<1x4x64xf32> to vector<4x64xf32>
    %106 = tpu.concatenate %101, %103, %105 in 0 : vector<2x64xf32>, vector<2x64xf32>, vector<4x64xf32> -> vector<8x64xf32>
    %107 = tpu.transpose %106, [1, 0] : vector<8x64xf32> -> vector<64x8xf32>
    %c0_43 = arith.constant 0 : index
    %c112 = arith.constant 112 : index
    %c0_44 = arith.constant 0 : index
    %108 = vector.load %arg10[%c0_43, %c112, %c0_44] : memref<1x1008x8xf32, #tpu.memory_space<vmem>>, vector<1x64x8xf32>
    %109 = vector.shape_cast %108 : vector<1x64x8xf32> to vector<64x8xf32>
    %110 = vector.shape_cast %107 : vector<64x8xf32> to vector<1x64x8xf32>
    tpu.vector_store %arg10[%c0_43, %c112, %c0_44], %110 {strides = array<i32>} : memref<1x1008x8xf32, #tpu.memory_space<vmem>>, vector<1x64x8xf32>,
    %111 = vector.extract_strided_slice %75 {offsets = [2, 0, 0], sizes = [1, 2, 64], strides = [1, 1, 1]} : vector<3x2x64xf32> to vector<1x2x64xf32>
    %112 = vector.shape_cast %111 : vector<1x2x64xf32> to vector<2x64xf32>
    %113 = vector.extract_strided_slice %81 {offsets = [2, 0, 0], sizes = [1, 2, 64], strides = [1, 1, 1]} : vector<3x2x64xf32> to vector<1x2x64xf32>
    %114 = vector.shape_cast %113 : vector<1x2x64xf32> to vector<2x64xf32>
    %115 = vector.extract_strided_slice %88 {offsets = [2, 0, 0], sizes = [1, 4, 64], strides = [1, 1, 1]} : vector<3x4x64xf32> to vector<1x4x64xf32>
    %116 = vector.shape_cast %115 : vector<1x4x64xf32> to vector<4x64xf32>
    %117 = tpu.concatenate %112, %114, %116 in 0 : vector<2x64xf32>, vector<2x64xf32>, vector<4x64xf32> -> vector<8x64xf32>
    %118 = tpu.transpose %117, [1, 0] : vector<8x64xf32> -> vector<64x8xf32>
    %c0_45 = arith.constant 0 : index
    %c176 = arith.constant 176 : index
    %c0_46 = arith.constant 0 : index
    %119 = vector.load %arg10[%c0_45, %c176, %c0_46] : memref<1x1008x8xf32, #tpu.memory_space<vmem>>, vector<1x64x8xf32>
    %120 = vector.shape_cast %119 : vector<1x64x8xf32> to vector<64x8xf32>
    %121 = vector.shape_cast %118 : vector<64x8xf32> to vector<1x64x8xf32>
    tpu.vector_store %arg10[%c0_45, %c176, %c0_46], %121 {strides = array<i32>} : memref<1x1008x8xf32, #tpu.memory_space<vmem>>, vector<1x64x8xf32>,
    %c0_47 = arith.constant 0 : index
    %c0_48 = arith.constant 0 : index
    %122 = vector.load %arg8[%c0_47, %c0_48] : memref<2x256xf32, #tpu.memory_space<vmem>>, vector<2x256xf32>
    %c0_49 = arith.constant 0 : index
    %c0_50 = arith.constant 0 : index
    %c0_51 = arith.constant 0 : index
    %123 = vector.load %arg9[%c0_49, %c0_50, %c0_51] : memref<3x4x1xf32, #tpu.memory_space<vmem>>, vector<3x4x1xf32>
    %c0_52 = arith.constant 0 : index
    %c0_53 = arith.constant 0 : index
    %c0_54 = arith.constant 0 : index
    %c0_55 = arith.constant 0 : index
    %124 = vector.load %arg7[%c0_52, %c0_53, %c0_54, %c0_55] : memref<1x3x8x256xf32, #tpu.memory_space<vmem>>, vector<1x3x2x256xf32>
    %125 = vector.shape_cast %124 : vector<1x3x2x256xf32> to vector<3x2x256xf32>
    %126 = arith.negf %125 : vector<3x2x256xf32>
    %127 = math.exp %126 : vector<3x2x256xf32>
    %cst_56 = arith.constant 1.000000e+00 : f32
    %128 = vector.broadcast %cst_56 : f32 to vector<3x2x256xf32>
    %129 = arith.addf %128, %127 : vector<3x2x256xf32>
    %130 = arith.divf %128, %129 : vector<3x2x256xf32>
    %131 = vector.shape_cast %122 : vector<2x256xf32> to vector<1x2x256xf32>
    %132 = vector.broadcast %131 : vector<1x2x256xf32> to vector<3x2x256xf32>
    %133 = arith.addf %130, %132 : vector<3x2x256xf32>
    %134 = vector.extract_strided_slice %123 {offsets = [0, 0, 0], sizes = [3, 2, 1], strides = [1, 1, 1]} : vector<3x4x1xf32> to vector<3x2x1xf32>
    %135 = vector.broadcast %134 : vector<3x2x1xf32> to vector<3x2x256xf32>
    %136 = arith.mulf %133, %135 : vector<3x2x256xf32>
    %c0_57 = arith.constant 0 : index
    %c0_58 = arith.constant 0 : index
    %c2_59 = arith.constant 2 : index
    %c0_60 = arith.constant 0 : index
    %137 = vector.load %arg7[%c0_57, %c0_58, %c2_59, %c0_60] : memref<1x3x8x256xf32, #tpu.memory_space<vmem>>, vector<1x3x2x256xf32>
    %138 = vector.shape_cast %137 : vector<1x3x2x256xf32> to vector<3x2x256xf32>
    %139 = math.exp %138 : vector<3x2x256xf32>
    %140 = vector.extract_strided_slice %123 {offsets = [0, 2, 0], sizes = [3, 2, 1], strides = [1, 1, 1]} : vector<3x4x1xf32> to vector<3x2x1xf32>
    %141 = vector.broadcast %140 : vector<3x2x1xf32> to vector<3x2x256xf32>
    %142 = arith.mulf %139, %141 : vector<3x2x256xf32>
    %c0_61 = arith.constant 0 : index
    %c0_62 = arith.constant 0 : index
    %c4_63 = arith.constant 4 : index
    %c0_64 = arith.constant 0 : index
    %143 = vector.load %arg7[%c0_61, %c0_62, %c4_63, %c0_64] : memref<1x3x8x256xf32, #tpu.memory_space<vmem>>, vector<1x3x4x256xf32>
    %144 = vector.shape_cast %143 : vector<1x3x4x256xf32> to vector<3x4x256xf32>
    %145 = arith.negf %144 : vector<3x4x256xf32>
    %146 = math.exp %145 : vector<3x4x256xf32>
    %cst_65 = arith.constant 1.000000e+00 : f32
    %147 = vector.broadcast %cst_65 : f32 to vector<3x4x256xf32>
    %148 = arith.addf %147, %146 : vector<3x4x256xf32>
    %149 = arith.divf %147, %148 : vector<3x4x256xf32>
    %150 = vector.extract_strided_slice %136 {offsets = [0, 0, 0], sizes = [1, 2, 256], strides = [1, 1, 1]} : vector<3x2x256xf32> to vector<1x2x256xf32>
    %151 = vector.shape_cast %150 : vector<1x2x256xf32> to vector<2x256xf32>
    %152 = vector.extract_strided_slice %142 {offsets = [0, 0, 0], sizes = [1, 2, 256], strides = [1, 1, 1]} : vector<3x2x256xf32> to vector<1x2x256xf32>
    %153 = vector.shape_cast %152 : vector<1x2x256xf32> to vector<2x256xf32>
    %154 = vector.extract_strided_slice %149 {offsets = [0, 0, 0], sizes = [1, 4, 256], strides = [1, 1, 1]} : vector<3x4x256xf32> to vector<1x4x256xf32>
    %155 = vector.shape_cast %154 : vector<1x4x256xf32> to vector<4x256xf32>
    %156 = tpu.concatenate %151, %153, %155 in 0 : vector<2x256xf32>, vector<2x256xf32>, vector<4x256xf32> -> vector<8x256xf32>
    %157 = tpu.transpose %156, [1, 0] : vector<8x256xf32> -> vector<256x8xf32>
    %c0_66 = arith.constant 0 : index
    %c240 = arith.constant 240 : index
    %c0_67 = arith.constant 0 : index
    %158 = vector.load %arg10[%c0_66, %c240, %c0_67] : memref<1x1008x8xf32, #tpu.memory_space<vmem>>, vector<1x256x8xf32>
    %159 = vector.shape_cast %158 : vector<1x256x8xf32> to vector<256x8xf32>
    %160 = vector.shape_cast %157 : vector<256x8xf32> to vector<1x256x8xf32>
    tpu.vector_store %arg10[%c0_66, %c240, %c0_67], %160 {strides = array<i32>} : memref<1x1008x8xf32, #tpu.memory_space<vmem>>, vector<1x256x8xf32>,
    %161 = vector.extract_strided_slice %136 {offsets = [1, 0, 0], sizes = [1, 2, 256], strides = [1, 1, 1]} : vector<3x2x256xf32> to vector<1x2x256xf32>
    %162 = vector.shape_cast %161 : vector<1x2x256xf32> to vector<2x256xf32>
    %163 = vector.extract_strided_slice %142 {offsets = [1, 0, 0], sizes = [1, 2, 256], strides = [1, 1, 1]} : vector<3x2x256xf32> to vector<1x2x256xf32>
    %164 = vector.shape_cast %163 : vector<1x2x256xf32> to vector<2x256xf32>
    %165 = vector.extract_strided_slice %149 {offsets = [1, 0, 0], sizes = [1, 4, 256], strides = [1, 1, 1]} : vector<3x4x256xf32> to vector<1x4x256xf32>
    %166 = vector.shape_cast %165 : vector<1x4x256xf32> to vector<4x256xf32>
    %167 = tpu.concatenate %162, %164, %166 in 0 : vector<2x256xf32>, vector<2x256xf32>, vector<4x256xf32> -> vector<8x256xf32>
    %168 = tpu.transpose %167, [1, 0] : vector<8x256xf32> -> vector<256x8xf32>
    %c0_68 = arith.constant 0 : index
    %c496 = arith.constant 496 : index
    %c0_69 = arith.constant 0 : index
    %169 = vector.load %arg10[%c0_68, %c496, %c0_69] : memref<1x1008x8xf32, #tpu.memory_space<vmem>>, vector<1x256x8xf32>
    %170 = vector.shape_cast %169 : vector<1x256x8xf32> to vector<256x8xf32>
    %171 = vector.shape_cast %168 : vector<256x8xf32> to vector<1x256x8xf32>
    tpu.vector_store %arg10[%c0_68, %c496, %c0_69], %171 {strides = array<i32>} : memref<1x1008x8xf32, #tpu.memory_space<vmem>>, vector<1x256x8xf32>,
    %172 = vector.extract_strided_slice %136 {offsets = [2, 0, 0], sizes = [1, 2, 256], strides = [1, 1, 1]} : vector<3x2x256xf32> to vector<1x2x256xf32>
    %173 = vector.shape_cast %172 : vector<1x2x256xf32> to vector<2x256xf32>
    %174 = vector.extract_strided_slice %142 {offsets = [2, 0, 0], sizes = [1, 2, 256], strides = [1, 1, 1]} : vector<3x2x256xf32> to vector<1x2x256xf32>
    %175 = vector.shape_cast %174 : vector<1x2x256xf32> to vector<2x256xf32>
    %176 = vector.extract_strided_slice %149 {offsets = [2, 0, 0], sizes = [1, 4, 256], strides = [1, 1, 1]} : vector<3x4x256xf32> to vector<1x4x256xf32>
    %177 = vector.shape_cast %176 : vector<1x4x256xf32> to vector<4x256xf32>
    %178 = tpu.concatenate %173, %175, %177 in 0 : vector<2x256xf32>, vector<2x256xf32>, vector<4x256xf32> -> vector<8x256xf32>
    %179 = tpu.transpose %178, [1, 0] : vector<8x256xf32> -> vector<256x8xf32>
    %c0_70 = arith.constant 0 : index
    %c752 = arith.constant 752 : index
    %c0_71 = arith.constant 0 : index
    %180 = vector.load %arg10[%c0_70, %c752, %c0_71] : memref<1x1008x8xf32, #tpu.memory_space<vmem>>, vector<1x256x8xf32>
    %181 = vector.shape_cast %180 : vector<1x256x8xf32> to vector<256x8xf32>
    %182 = vector.shape_cast %179 : vector<256x8xf32> to vector<1x256x8xf32>
    tpu.vector_store %arg10[%c0_70, %c752, %c0_71], %182 {strides = array<i32>} : memref<1x1008x8xf32, #tpu.memory_space<vmem>>, vector<1x256x8xf32>,
    return
  }
  func.func @transform_0(%arg0: i32) -> (i32, i32, i32, i32) {
    %c0_i32 = arith.constant 0 : i32
    %c0_i32_0 = arith.constant 0 : i32
    %c0_i32_1 = arith.constant 0 : i32
    %c0_i32_2 = arith.constant 0 : i32
    return %arg0, %c0_i32, %c0_i32_0, %c0_i32_1 : i32, i32, i32, i32
  }
  func.func @transform_1(%arg0: i32) -> (i32, i32) {
    %c0_i32 = arith.constant 0 : i32
    %c0_i32_0 = arith.constant 0 : i32
    %c0_i32_1 = arith.constant 0 : i32
    return %c0_i32, %c0_i32_0 : i32, i32
  }
  func.func @transform_2(%arg0: i32) -> (i32, i32, i32) {
    %c0_i32 = arith.constant 0 : i32
    %c0_i32_0 = arith.constant 0 : i32
    %c0_i32_1 = arith.constant 0 : i32
    %c0_i32_2 = arith.constant 0 : i32
    return %c0_i32, %c0_i32_0, %c0_i32_1 : i32, i32, i32
  }
  func.func @transform_3(%arg0: i32) -> (i32, i32, i32, i32) {
    %c0_i32 = arith.constant 0 : i32
    %c0_i32_0 = arith.constant 0 : i32
    %c0_i32_1 = arith.constant 0 : i32
    %c0_i32_2 = arith.constant 0 : i32
    return %arg0, %c0_i32, %c0_i32_0, %c0_i32_1 : i32, i32, i32, i32
  }
  func.func @transform_4(%arg0: i32) -> (i32, i32) {
    %c0_i32 = arith.constant 0 : i32
    %c0_i32_0 = arith.constant 0 : i32
    %c0_i32_1 = arith.constant 0 : i32
    return %c0_i32, %c0_i32_0 : i32, i32
  }
  func.func @transform_5(%arg0: i32) -> (i32, i32, i32) {
    %c0_i32 = arith.constant 0 : i32
    %c0_i32_0 = arith.constant 0 : i32
    %c0_i32_1 = arith.constant 0 : i32
    %c0_i32_2 = arith.constant 0 : i32
    return %c0_i32, %c0_i32_0, %c0_i32_1 : i32, i32, i32
  }
  func.func @transform_6(%arg0: i32) -> (i32, i32, i32, i32) {
    %c0_i32 = arith.constant 0 : i32
    %c0_i32_0 = arith.constant 0 : i32
    %c0_i32_1 = arith.constant 0 : i32
    %c0_i32_2 = arith.constant 0 : i32
    return %arg0, %c0_i32, %c0_i32_0, %c0_i32_1 : i32, i32, i32, i32
  }
  func.func @transform_7(%arg0: i32) -> (i32, i32) {
    %c0_i32 = arith.constant 0 : i32
    %c0_i32_0 = arith.constant 0 : i32
    %c0_i32_1 = arith.constant 0 : i32
    return %c0_i32, %c0_i32_0 : i32, i32
  }
  func.func @transform_8(%arg0: i32) -> (i32, i32, i32) {
    %c0_i32 = arith.constant 0 : i32
    %c0_i32_0 = arith.constant 0 : i32
    %c0_i32_1 = arith.constant 0 : i32
    %c0_i32_2 = arith.constant 0 : i32
    return %c0_i32, %c0_i32_0, %c0_i32_1 : i32, i32, i32
  }
  func.func @transform_9(%arg0: i32) -> (i32, i32, i32) {
    %c0_i32 = arith.constant 0 : i32
    %c0_i32_0 = arith.constant 0 : i32
    %c0_i32_1 = arith.constant 0 : i32
    return %arg0, %c0_i32, %c0_i32_0 : i32, i32, i32
  }
}

</mosaic_0001>

<bundles_post_ra>
// kernel: yolov3_eval_decoder.1
= control target key start
LH: loop header
LB: loop body
LE: loop exit
PB: predicated region body
PF: predicated region fallthrough
CT: control target
= control target key end

     0   :  { %s1893_s30 = smov 0   ;;  %s2587_s0 = inlined_call_operand.vmem [shape: f32[2,3,8,16], index: 0, kind: input, shape index: {}]   ;;  %s2588_s1 = inlined_call_operand.vmem [shape: f32[2,16], index: 1, kind: input, shape index: {}]   ;;  %s2589_s2 = inlined_call_operand.vmem [shape: f32[3,4,1], index: 2, kind: input, shape index: {}]   ;;  %s2590_s3 = inlined_call_operand.vmem [shape: f32[2,3,8,64], index: 3, kind: input, shape index: {}]   ;;  %s2591_s4 = inlined_call_operand.vmem [shape: f32[2,64], index: 4, kind: input, shape index: {}]   ;;  %s2592_s5 = inlined_call_operand.vmem [shape: f32[3,4,1], index: 5, kind: input, shape index: {}]   ;;  %s2593_s6 = inlined_call_operand.vmem [shape: f32[2,3,8,256], index: 6, kind: input, shape index: {}]   ;;  %s2594_s7 = inlined_call_operand.vmem [shape: f32[2,256], index: 7, kind: input, shape index: {}]   ;;  %s2595_s8 = inlined_call_operand.vmem [shape: f32[3,4,1], index: 8, kind: input, shape index: {}]   ;;  %s2596_s9 = inlined_call_operand.vmem [shape: f32[2,1008,8], index: 9, kind: output, shape index: {}]  }
   0x1 LB: > { %s1663_s10 = sadd.s32 4294967295, %s1840_s30   ;;  %p1667_p0 = scmp.ge.s32.totalorder %s1840_s30, 1  ;;  %s1840_s30 = sphi %s1893_s30, %s19_s30  }
   0x2   : > { %p307_p1 = scmp.lt.s32.totalorder %s1840_s30, 3 }
   0x4   : > { %p308_p2 = pnand %p1667_p0, %p307_p1 }
   0x5   : > { %p353_p3 = scmp.lt.s32.totalorder (!%p308_p2), %s1663_s10, 1 }
   0x6   : > { %311 = sbr.rel (%p308_p2) target bundleno = 708 (0x2c4), region = 56 }
   0xb   : > { %v374_v0 = vld [vmem:[%s2589_s2] sm:$0xf]  ;;  %v1842_v1 = vmov 0   ;;  %v376_v2 = vld [vmem:[%s2589_s2 + $0x8] sm:$0xf]  ;;  %s2628_s10 = smov (!%p353_p3, %s1663_s10), 1 }
   0xc   : > { %1711 = vset.pattern.permute.xlu0 %v1842_v1  ;;  %1712 = vset.pattern.permute.xlu1 %v1842_v1  ;;  %v668_v3 = vld [vmem:[%s2592_s5 + $0x8] sm:$0xf]  ;;  %v375_v4 = vld [vmem:[%s2589_s2 + $0x4] sm:$0xf]  ;;  %v973_v5 = vld [vmem:[%s2595_s8] sm:$0xf] }
   0xd   : > { %442 = vperm.xlu0 %1711, %v374_v0   ;;  %452 = vperm.xlu1 %1712, %v376_v2   ;;  %v975_v6 = vld [vmem:[%s2595_s8 + $0x8] sm:$0xf]  ;;  %v666_v7 = vld [vmem:[%s2592_s5] sm:$0xf]  ;;  %v667_v8 = vld [vmem:[%s2592_s5 + $0x4] sm:$0xf] }
   0xe   : > { %1713 = vset.pattern.permute.xlu2 %v1842_v1  ;;  %v974_v9 = vld [vmem:[%s2595_s8 + $0x4] sm:$0xf]  ;;  %s1698_s29 = smul.u32 24, %s2628_s10  ;;  %v972_v38 = vld [vmem:[%s2594_s7] sm:$0xf]  ;;  %vm542_vm14 = vcmask 1041408  }
   0xf   : > { %744 = vperm.xlu2 %1713, %v668_v3   ;;  %1097 = vst [vmem:[#allocation1] ss:$4 sm:$0xff] %v972_v38  ;;  %s1699_s19 = smul.u32 48, %s2628_s10  ;;  %vm544_vm15 = vcmask 1043456  }
  0x10   : > { %s1934_s13 = scalar_lea.vmem %s2587_s0, %s1698_s29  ;;  %s1945_s16 = scalar_lea.vmem %s2590_s3, %s1698_s29  ;;  %1101 = vst [vmem:[#allocation1 + $0x20] ss:$4 sm:$0xff] %v972_v38 }
  0x11   : > { %v377_v10 = vld [vmem:[%s1934_s13] sm:$0x3]  ;;  %v476_v12 = vld [vmem:[%s1934_s13 + $0x4] sm:$0xf]  ;;  %v378_v13 = vld [vmem:[%s1934_s13 + $0x8] sm:$0x3]  ;;  %s1997_s22 = scalar_lea.vmem %s2593_s6, %s1699_s19 }
  0x12   : > { %v1672_v11 = vmul.f32 -1.442695, %v377_v10  ;;  %v1675_v14 = vmul.f32 -1.442695, %v476_v12  ;;  %v1673_v15 = vmul.f32 -1.442695, %v378_v13 }
  0x13   : > { %v477_v17 = vld [vmem:[%s1934_s13 + $0xc] sm:$0xf]  ;;  %v669_v21 = vld [vmem:[%s1945_s16] sm:$0x3]  ;;  %v379_v31 = vld [vmem:[%s1934_s13 + $0x10] sm:$0x3] }
  0x14   : > { %1714 = vpow2.f32 %v1672_v11  ;;  %v1676_v19 = vmul.f32 -1.442695, %v477_v17  ;;  %v1678_v24 = vmul.f32 -1.442695, %v669_v21  ;;  %v1674_v36 = vmul.f32 -1.442695, %v379_v31 }
  0x15   : > { %447 = vperm.xlu0 %1711, %v375_v4   ;;  %1121 = vperm.xlu1 %1712, %v973_v5   ;;  %1716 = vpow2.f32 %v1675_v14  ;;  %v768_v41 = vld [vmem:[%s1945_s16 + $0x4] sm:$0xf]  ;;  %v458_v42 = vld [vmem:[%s1934_s13 + $0x2] sm:$0x3]  ;;  %v670_v44 = vld [vmem:[%s1945_s16 + $0x8] sm:$0x3] }
  0x16   : > { %1718 = vpow2.f32 %v1673_v15  ;;  %v1681_v45 = vmul.f32 -1.442695, %v768_v41  ;;  %v461_v49 = vmul.f32 1.442695, %v458_v42  ;;  %v1679_v54 = vmul.f32 -1.442695, %v670_v44 }
  0x17   : > { %1131 = vperm.xlu2 %1713, %v975_v6   ;;  %v2001_v56 = vld.sshfl [vmem:[#allocation1] sm:$0xff pattern:$0x73625140]  ;;  %v2003_v57 = vld.sshfl [vmem:[#allocation1 + $0x8] sm:$0xff pattern:$0x73625140] }
  0x18   : > { %1104 = vst [vmem:[#allocation1] ss:$4 sm:$0xff] %v972_v38  ;;  %v976_v3 = vld [vmem:[%s1997_s22] sm:$0x3]  ;;  %v459_v4 = vld [vmem:[%s1934_s13 + $0xa] sm:$0x3] }
  0x19   : > { %v2040_v13 = vld [vmem:[%s2588_s1] sm:$0x3]  ;;  %s1700_s27 = smul.u32 1008, %s2628_s10 }
  0x1a   : > { %v1715_v16 = vpop.eup %1714 }
  0x1b   : > { %v1940_v18 = vadd.f32 1.0, %v1715_v16  ;;  %v1717_v20 = vpop.eup %1716  ;;  %v1684_v16 = vmul.f32 -1.442695, %v976_v3  ;;  %s2311_s11 = scalar_lea.vmem %s2596_s9, %s1700_s27 }
  0x1c   : > { %v1719_v22 = vpop.eup %1718  ;;  %v1949_v23 = vadd.f32 1.0, %v1717_v20 }
  0x1d   : > { %734 = vperm.xlu0 %1711, %v666_v7   ;;  %1720 = vrcp.f32 %v1940_v18  ;;  %v1951_v25 = vadd.f32 1.0, %v1719_v22  ;;  %vm397_vm0 = vweird.f32 %v1940_v18  ;;  %v403_v48 = vand.u32 2147483648, %v1940_v18 }
  0x1e   : > { %1722 = vpow2.f32 %v1676_v19  ;;  %v401_v52 = vand.u32 2147483647, %v1940_v18  ;;  %vm496_vm4 = vweird.f32 %v1949_v23  ;;  %v502_v0 = vand.u32 2147483648, %v1949_v23 }
  0x1f   : > { %1724 = vrcp.f32 %v1949_v23  ;;  %v404_v60 = vor.u32 1.1754944e-38, %v403_v48  ;;  %vm412_vm6 = vweird.f32 %v1951_v25  ;;  %v418_v1 = vand.u32 2147483648, %v1951_v25 }
  0x20   : > { %1726 = vpow2.f32 %v1678_v24  ;;  %vm2011_vm3 = vcmp.eq.f32.partialorder %v401_v52, 8.507059e+37  ;;  %v500_v5 = vand.u32 2147483647, %v1949_v23  ;;  %v463_v19 = vmul.f32 1.442695, %v459_v4 }
  0x21   : > { %1728 = vrcp.f32 %v1951_v25  ;;  %v503_v20 = vor.u32 1.1754944e-38, %v502_v0 }
  0x22   : > { %vm501_vm10 = vcmp.eq.f32.partialorder %v500_v5, 8.507059e+37  ;;  %v478_v5 = vld [vmem:[%s1934_s13 + $0x14] sm:$0xf] }
  0x23   : > { %v1953_v26 = vpop.eup %1720 }
  0x24   : > { %v1723_v27 = vpop.eup %1722  ;;  %v393_v28 = vmul.f32 %v1953_v26, %v1940_v18  ;;  %vm398_vm1 = vweird.f32 %v1953_v26  ;;  %v419_v18 = vor.u32 1.1754944e-38, %v418_v1 }
  0x25   : > { %739 = vperm.xlu0 %1711, %v667_v8   ;;  %v1959_v29 = vadd.f32 1.0, %v1723_v27  ;;  %v1961_v30 = vpop.eup %1724  ;;  %vm1988_vm2 = vmor %vm397_vm0, %vm398_vm1 }
  0x26   : > { %v1727_v32 = vpop.eup %1726  ;;  %v394_v33 = vsub.f32 1.0, %v393_v28  ;;  %v492_v35 = vmul.f32 %v1961_v30, %v1949_v23  ;;  %vm497_vm5 = vweird.f32 %v1961_v30 }
  0x27   : > { %v1964_v34 = vpop.eup %1728  ;;  %1730 = vrcp.f32 %v1959_v29  ;;  %v1969_v37 = vadd.f32 1.0, %v1727_v32  ;;  %vm2031_vm8 = vmor %vm496_vm4, %vm497_vm5  ;;  %vm511_vm12 = vweird.f32 %v1959_v29  ;;  %v750_v32 = vld [vmem:[%s1945_s16 + $0x2] sm:$0x3] }
  0x28   : > { %v395_v39 = vmul.f32 %v1953_v26, %v394_v33  ;;  %v408_v40 = vmul.f32 %v1964_v34, %v1951_v25  ;;  %v493_v43 = vsub.f32 1.0, %v492_v35  ;;  %1732 = vpow2.f32 %v1674_v36 }
  0x29   : > { %1734 = vrcp.f32 %v1969_v37  ;;  %vm413_vm7 = vweird.f32 %v1964_v34  ;;  %v517_v33 = vand.u32 2147483648, %v1959_v29  ;;  %v515_v36 = vand.u32 2147483647, %v1959_v29 }
  0x2a   : > { %v396_v47 = vadd.f32 %v1953_v26, %v395_v39  ;;  %v409_v50 = vsub.f32 1.0, %v408_v40  ;;  %v494_v53 = vmul.f32 %v1961_v30, %v493_v43  ;;  %1736 = vpow2.f32 %v1681_v45  ;;  %vm2048_vm9 = vmor %vm412_vm6, %vm413_vm7 }
  0x2b   : > { %1738 = vpow2.f32 %v461_v49  ;;  %vm689_vm1 = vweird.f32 %v1969_v37  ;;  %v695_v44 = vand.u32 2147483648, %v1969_v37  ;;  %v753_v45 = vmul.f32 1.442695, %v750_v32 }
  0x2c   : > { %v400_v59 = vsel %vm1988_vm2, %v1953_v26, %v396_v47  ;;  %v410_v61 = vmul.f32 %v1964_v34, %v409_v50  ;;  %v495_v2 = vadd.f32 %v1961_v30, %v494_v53  ;;  %1740 = vpow2.f32 %v1679_v54 }
  0x2d   : > { %1126 = vperm.xlu0 %1711, %v974_v9   ;;  %v1984_v46 = vpop.eup %1730  ;;  %v416_v9 = vand.u32 2147483647, %v1951_v25  ;;  %v405_v14 = vsel %vm2011_vm3, %v404_v60, %v400_v59  ;;  %v693_v51 = vand.u32 2147483647, %v1969_v37  ;;  %vm2090_vm3 = vcmp.eq.f32.partialorder %v515_v36, 8.507059e+37 }
  0x2e   : > { %v507_v55 = vmul.f32 %v1984_v46, %v1959_v29  ;;  %v1733_v58 = vpop.eup %1732  ;;  %v411_v8 = vadd.f32 %v1964_v34, %v410_v61  ;;  %v499_v22 = vsel %vm2031_vm8, %v1961_v30, %v495_v2  ;;  %v437_v28 = vadd.f32 %v405_v14, %v2040_v13 }
  0x2f   : > { %v2009_v62 = vpop.eup %1734  ;;  %v2025_v6 = vadd.f32 1.0, %v1733_v58  ;;  %vm417_vm11 = vcmp.eq.f32.partialorder %v416_v9, 8.507059e+37  ;;  %vm512_vm13 = vweird.f32 %v1984_v46  ;;  %v504_v31 = vsel %vm501_vm10, %v503_v20, %v499_v22  ;;  %v2136_v22 = vld [vmem:[%s2591_s4] sm:$0x3] }
  0x30   : > { %v508_v7 = vsub.f32 1.0, %v507_v55  ;;  %v685_v11 = vmul.f32 %v2009_v62, %v1969_v37  ;;  %v1737_v12 = vpop.eup %1736  ;;  %v415_v24 = vsel %vm2048_vm9, %v1964_v34, %v411_v8  ;;  %vm2073_vm0 = vmor %vm511_vm12, %vm512_vm13  ;;  %v540_v43 = vrot.slane %v504_v31, 4 }
  0x31   : > { %v1739_v17 = vpop.eup %1738  ;;  %v2052_v21 = vadd.f32 1.0, %v1737_v12  ;;  %1742 = vrcp.f32 %v2025_v6  ;;  %v420_v34 = vsel %vm417_vm11, %v419_v18, %v415_v24  ;;  %vm690_vm2 = vweird.f32 %v2009_v62  ;;  %v769_v24 = vld [vmem:[%s1945_s16 + $0xc] sm:$0xf] }
  0x32   : > { %v509_v23 = vmul.f32 %v1984_v46, %v508_v7  ;;  %v686_v25 = vsub.f32 1.0, %v685_v11  ;;  %v1741_v26 = vpop.eup %1740  ;;  %v518_v29 = vor.u32 1.1754944e-38, %v517_v33  ;;  %vm2104_vm4 = vmor %vm689_vm1, %vm690_vm2  ;;  %v438_v1 = vadd.f32 %v420_v34, %v2040_v13 }
  0x33   : > { %1744 = vrcp.f32 %v2052_v21  ;;  %v2077_v41 = vadd.f32 1.0, %v1741_v26  ;;  %vm788_vm5 = vweird.f32 %v2052_v21  ;;  %v794_v4 = vand.u32 2147483648, %v2052_v21 }
  0x34   : > { %1746 = vpow2.f32 %v1684_v16  ;;  %v510_v35 = vadd.f32 %v1984_v46, %v509_v23  ;;  %v687_v39 = vmul.f32 %v2009_v62, %v686_v25  ;;  %v696_v37 = vor.u32 1.1754944e-38, %v695_v44  ;;  %v460_v25 = vld [vmem:[%s1934_s13 + $0x12] sm:$0x3] }
  0x35   : > { %1748 = vpow2.f32 %v463_v19  ;;  %v792_v8 = vand.u32 2147483647, %v2052_v21  ;;  %vm694_vm7 = vcmp.eq.f32.partialorder %v693_v51, 8.507059e+37  ;;  %v795_v20 = vor.u32 1.1754944e-38, %v794_v4 }
  0x36   : > { %v514_v52 = vsel %vm2073_vm0, %v1984_v46, %v510_v35  ;;  %v688_v60 = vadd.f32 %v2009_v62, %v687_v39  ;;  %1750 = vrcp.f32 %v2077_v41  ;;  %v465_v39 = vmul.f32 1.442695, %v460_v25 }
  0x37   : > { %v2079_v42 = vpop.eup %1742  ;;  %v519_v3 = vsel %vm2090_vm3, %v518_v29, %v514_v52  ;;  %1752 = vpow2.f32 %v753_v45  ;;  %vm793_vm9 = vcmp.eq.f32.partialorder %v792_v8, 8.507059e+37  ;;  %vm427_vm10 = vweird.f32 %v2025_v6 }
  0x38   : > { %v423_v59 = vmul.f32 %v2079_v42, %v2025_v6  ;;  %v692_v10 = vsel %vm2104_vm4, %v2009_v62, %v688_v60  ;;  %v585_v15 = vrot.slane %v519_v3, 4  ;;  %vm428_vm11 = vweird.f32 %v2079_v42 }
  0x39   : > { %v2083_v47 = vpop.eup %1744  ;;  %v433_v44 = vand.u32 2147483648, %v2025_v6  ;;  %vm2161_vm12 = vmor %vm427_vm10, %vm428_vm11  ;;  %vm704_vm0 = vweird.f32 %v2077_v41  ;;  %v708_v4 = vand.u32 2147483647, %v2077_v41 }
  0x3a   : > { %v1747_v50 = vpop.eup %1746  ;;  %v784_v54 = vmul.f32 %v2083_v47, %v2052_v21  ;;  %vm789_vm6 = vweird.f32 %v2083_v47  ;;  %v424_v14 = vsub.f32 1.0, %v423_v59  ;;  %v697_v21 = vsel %vm694_vm7, %v696_v37, %v692_v10 }
  0x3b   : > { %v1749_v55 = vpop.eup %1748  ;;  %v2120_v11 = vadd.f32 1.0, %v1747_v50  ;;  %vm2126_vm8 = vmor %vm788_vm5, %vm789_vm6  ;;  %v729_v34 = vadd.f32 %v697_v21, %v2136_v22  ;;  %v431_v50 = vand.u32 2147483647, %v2025_v6  ;;  %v434_v60 = vor.u32 1.1754944e-38, %v433_v44  ;;  %v1140_v44 = vld [vmem:[%s1997_s22] sm:$0xc] }
  0x3c   : > { %v785_v0 = vsub.f32 1.0, %v784_v54  ;;  %v2131_v62 = vpop.eup %1750  ;;  %vm2202_vm4 = vcmp.eq.f32.partialorder %v708_v4, 8.507059e+37 }
  0x3d   : > { %1754 = vrcp.f32 %v2120_v11  ;;  %v700_v33 = vmul.f32 %v2131_v62, %v2077_v41  ;;  %vm2173_vm13 = vcmp.eq.f32.partialorder %v431_v50, 8.507059e+37  ;;  %vm705_vm1 = vweird.f32 %v2131_v62 }
  0x3e   : > { %v786_v7 = vmul.f32 %v2083_v47, %v785_v0  ;;  %vm2195_vm2 = vmor %vm704_vm0, %vm705_vm1  ;;  %vm1011_vm3 = vweird.f32 %v2120_v11 }
  0x3f   : > { %v701_v45 = vsub.f32 1.0, %v700_v33 }
  0x40   : > { %v787_v16 = vadd.f32 %v2083_v47, %v786_v7  ;;  %v710_v7 = vand.u32 2147483648, %v2077_v41 }
  0x42   : > { %v791_v23 = vsel %vm2126_vm8, %v2083_v47, %v787_v16  ;;  %v751_v47 = vld [vmem:[%s1945_s16 + $0xa] sm:$0x3] }
  0x43   : > { %v796_v36 = vsel %vm793_vm9, %v795_v20, %v791_v23  ;;  %v711_v23 = vor.u32 1.1754944e-38, %v710_v7 }
  0x7f   : > { %v443_v27 = vpop.permute.xlu0 %442  ;;  %v453_v3 = vpop.permute.xlu1 %452 }
  0x80   : > { %v467_v30 = vrot.slane %v443_v27, 2  ;;  %v455_v48 = vmul.f32 %v443_v27, %v437_v28  ;;  %v1164_v27 = vld [vmem:[%s1997_s22] sm:$0xf0]  ;;  %v1753_v28 = vpop.eup %1752  ;;  %v469_v37 = vrot.slane %v453_v3, 2 }
  0x81   : > { %v1690_v40 = vmul.f32 -1.442695, %v1164_v27 }
  0x82   : > { %v473_v38 = vmul.f32 %v1739_v17, %v467_v30  ;;  %v1677_v17 = vmul.f32 -1.442695, %v478_v5  ;;  %v425_v30 = vmul.f32 %v2079_v42, %v424_v14 }
  0x84   : > { %v537_v49 = vrot.slane %v473_v38, 6  ;;  %1756 = vpow2.f32 %v1677_v17  ;;  %v1682_v38 = vmul.f32 -1.442695, %v769_v24  ;;  %v426_v29 = vadd.f32 %v2079_v42, %v425_v30 }
  0x86   : > { %v543_v58 = vsel %vm542_vm14, %v455_v48, %v537_v49  ;;  %1758 = vpow2.f32 %v1682_v38  ;;  %v832_v48 = vrot.slane %v796_v36, 4  ;;  %v2155_v49 = vpop.eup %1754  ;;  %v430_v6 = vsel %vm2161_vm12, %v2079_v42, %v426_v29  ;;  %v671_v42 = vld [vmem:[%s1945_s16 + $0x10] sm:$0x3] }
  0x87   : > { %v448_v61 = vpop.permute.xlu0 %447  ;;  %v545_v46 = vsel %vm544_vm15, %v543_v58, %v540_v43  ;;  %1760 = vpow2.f32 %v1690_v40  ;;  %v435_v10 = vsel %vm2173_vm13, %v434_v60, %v430_v6  ;;  %v1680_v17 = vmul.f32 -1.442695, %v671_v42 }
  0x88   : > { %v468_v2 = vrot.slane %v448_v61, 2  ;;  %546 = vxpose.xlu1.b32.start.end [1/1] (short) (narrow) %v545_v46, 16  ;;  %v456_v18 = vmul.f32 %v448_v61, %v438_v1  ;;  %1762 = vpow2.f32 %v465_v39  ;;  %v702_v61 = vmul.f32 %v2131_v62, %v701_v45 }
  0x89   : > { %v1007_v1 = vmul.f32 %v2155_v49, %v2120_v11  ;;  %vm1012_vm5 = vweird.f32 %v2155_v49  ;;  %v1146_v60 = vmul.f32 1.442695, %v1140_v44 }
  0x8a   : > { %v474_v9 = vmul.f32 %v1749_v55, %v468_v2  ;;  %v1757_v53 = vpop.eup %1756  ;;  %v755_v55 = vmul.f32 1.442695, %v751_v47  ;;  %v703_v12 = vadd.f32 %v2131_v62, %v702_v61  ;;  %vm2237_vm12 = vmor %vm1011_vm3, %vm1012_vm5 }
  0x8b   : > { %v2166_v59 = vadd.f32 1.0, %v1757_v53  ;;  %v1008_v14 = vsub.f32 1.0, %v1007_v1 }
  0x8c   : > { %v582_v19 = vrot.slane %v474_v9, 6  ;;  %v1759_v63 = vpop.eup %1758  ;;  %v707_v41 = vsel %vm2195_vm2, %v2131_v62, %v703_v12 }
  0x8d   : > { %1764 = vrcp.f32 %v2166_v59  ;;  %v1761_v2 = vpop.eup %1760  ;;  %v2183_v5 = vadd.f32 1.0, %v1759_v63  ;;  %vm526_vm6 = vweird.f32 %v2166_v59  ;;  %v530_v62 = vand.u32 2147483647, %v2166_v59 }
  0x8e   : > { %v587_v26 = vsel %vm542_vm14, %v456_v18, %v582_v19  ;;  %1766 = vpow2.f32 %v755_v55  ;;  %v2187_v8 = vadd.f32 1.0, %v1761_v2  ;;  %v1763_v9 = vpop.eup %1762  ;;  %v439_v19 = vadd.f32 %v435_v10, %v2040_v13 }
  0x8f   : > { %v735_v31 = vpop.permute.xlu0 %734  ;;  %v588_v32 = vsel %vm544_vm15, %v587_v26, %v585_v15  ;;  %1768 = vrcp.f32 %v2183_v5  ;;  %v475_v20 = vmul.f32 %v1763_v9, %v469_v37  ;;  %v532_v26 = vand.u32 2147483648, %v2166_v59  ;;  %v770_v37 = vld [vmem:[%s1945_s16 + $0x14] sm:$0xf] }
  0x90   : > { %v759_v35 = vrot.slane %v735_v31, 2  ;;  %589 = vxpose.xlu2.b32.start.end [1/1] (short) (narrow) %v588_v32, 16  ;;  %v747_v51 = vmul.f32 %v735_v31, %v729_v34  ;;  %1770 = vrcp.f32 %v2187_v8  ;;  %v1017_v13 = vand.u32 2147483648, %v2120_v11 }
  0x91   : > { %1772 = vpow2.f32 %v1680_v17  ;;  %v457_v32 = vmul.f32 %v453_v3, %v439_v19  ;;  %v624_v33 = vrot.slane %v475_v20, 6  ;;  %v712_v34 = vsel %vm2202_vm4, %v711_v23, %v707_v41  ;;  %v978_v19 = vld [vmem:[%s1997_s22 + $0x10] sm:$0x3]  ;;  %v2270_v23 = vpop.permute.xlu1 %1121 }
  0x92   : > { %v765_v43 = vmul.f32 %v1753_v28, %v759_v35  ;;  %v1009_v28 = vmul.f32 %v2155_v49, %v1008_v14  ;;  %v533_v40 = vor.u32 1.1754944e-38, %v532_v26  ;;  %vm803_vm9 = vweird.f32 %v2183_v5 }
  0x93   : > { %v1765_v18 = vpop.eup %1764  ;;  %v730_v29 = vadd.f32 %v712_v34, %v2136_v22  ;;  %vm531_vm11 = vcmp.eq.f32.partialorder %v530_v62, 8.507059e+37  ;;  %v1015_v55 = vand.u32 2147483647, %v2120_v11  ;;  %v629_v1 = vsel %vm542_vm14, %v457_v32, %v624_v33 }
  0x94   : > { %v829_v52 = vrot.slane %v765_v43, 6  ;;  %v522_v25 = vmul.f32 %v1765_v18, %v2166_v59  ;;  %v1767_v27 = vpop.eup %1766  ;;  %vm527_vm7 = vweird.f32 %v1765_v18  ;;  %v809_v43 = vand.u32 2147483648, %v2183_v5 }
  0x95   : > { %v1769_v30 = vpop.eup %1768  ;;  %vm2223_vm8 = vmor %vm526_vm6, %vm527_vm7  ;;  %v1010_v53 = vadd.f32 %v2155_v49, %v1009_v28  ;;  %vm1016_vm1 = vcmp.eq.f32.partialorder %v1015_v55, 8.507059e+37  ;;  %1774 = vpow2.f32 %v1146_v60  ;;  %vm1199_vm2 = vweird.f32 %v2187_v8  ;;  %v745_v55 = vpop.permute.xlu2 %744 }
  0x96   : > { %v834_v58 = vsel %vm542_vm14, %v747_v51, %v829_v52  ;;  %v523_v31 = vsub.f32 1.0, %v522_v25  ;;  %v799_v35 = vmul.f32 %v1769_v30, %v2183_v5  ;;  %v2219_v36 = vpop.eup %1770  ;;  %vm804_vm10 = vweird.f32 %v1769_v30 }
  0x97   : > { %v835_v46 = vsel %vm544_vm15, %v834_v58, %v832_v48  ;;  %v740_v15 = vpop.permute.xlu0 %739  ;;  %v807_v48 = vand.u32 2147483647, %v2183_v5  ;;  %v1195_v51 = vmul.f32 %v2219_v36, %v2187_v8  ;;  %v1773_v52 = vpop.eup %1772  ;;  %v1018_v58 = vor.u32 1.1754944e-38, %v1017_v13  ;;  %vm2247_vm13 = vmor %vm803_vm9, %vm804_vm10 }
  0x98   : > { %836 = vxpose.xlu0.b32.start.end [1/1] (short) (narrow) %v835_v46, 64  ;;  %v760_v24 = vrot.slane %v740_v15, 2  ;;  %v524_v39 = vmul.f32 %v1765_v18, %v523_v31  ;;  %v800_v47 = vsub.f32 1.0, %v799_v35  ;;  %v810_v6 = vor.u32 1.1754944e-38, %v809_v43  ;;  %v1166_v35 = vld [vmem:[%s1997_s22 + $0x10] sm:$0xf0] }
  0x99   : > { %vm808_vm0 = vcmp.eq.f32.partialorder %v807_v48, 8.507059e+37  ;;  %v748_v2 = vmul.f32 %v740_v15, %v730_v29  ;;  %v1196_v4 = vsub.f32 1.0, %v1195_v51  ;;  %v2252_v42 = vadd.f32 1.0, %v1773_v52 }
  0x9a   : > { %v766_v38 = vmul.f32 %v1767_v27, %v760_v24  ;;  %v525_v50 = vadd.f32 %v1765_v18, %v524_v39  ;;  %v801_v59 = vmul.f32 %v1769_v30, %v800_v47  ;;  %v1014_v5 = vsel %vm2237_vm12, %v2155_v49, %v1010_v53 }
  0x9b   : > { %v1683_v15 = vmul.f32 -1.442695, %v770_v37  ;;  %v1019_v16 = vsel %vm1016_vm1, %v1018_v58, %v1014_v5  ;;  %v1197_v17 = vmul.f32 %v2219_v36, %v1196_v4  ;;  %1776 = vrcp.f32 %v2252_v42  ;;  %v1775_v21 = vpop.eup %1774 }
  0x9c   : > { %v877_v61 = vrot.slane %v766_v38, 6  ;;  %v529_v46 = vsel %vm2223_vm8, %v1765_v18, %v525_v50  ;;  %v802_v11 = vadd.f32 %v1769_v30, %v801_v59  ;;  %vm1200_vm3 = vweird.f32 %v2219_v36  ;;  %v752_v38 = vld [vmem:[%s1945_s16 + $0x12] sm:$0x3] }
  0x9d   : > { %v534_v0 = vsel %vm531_vm11, %v533_v40, %v529_v46  ;;  %v1113_v18 = vadd.f32 %v2001_v56, %v1019_v16  ;;  %v1205_v20 = vand.u32 2147483648, %v2187_v8  ;;  %1778 = vpow2.f32 %v1683_v15  ;;  %vm1201_vm4 = vmor %vm1199_vm2, %vm1200_vm3 }
  0x9e   : > { %v627_v3 = vrot.slane %v534_v0, 4  ;;  %v806_v7 = vsel %vm2247_vm13, %v1769_v30, %v802_v11  ;;  %v882_v12 = vsel %vm542_vm14, %v748_v2, %v877_v61  ;;  %v1198_v41 = vadd.f32 %v2219_v36, %v1197_v17 }
  0x9f   : > { %v811_v10 = vsel %vm808_vm0, %v810_v6, %v806_v7  ;;  %v1203_v24 = vand.u32 2147483647, %v2187_v8  ;;  %v1686_v26 = vmul.f32 -1.442695, %v978_v19  ;;  %v1134_v27 = vmul.f32 %v2270_v23, %v1113_v18 }
  0xa0   : > { %v630_v9 = vsel %vm544_vm15, %v629_v1, %v627_v3  ;;  %v880_v14 = vrot.slane %v811_v10, 4  ;;  %v1158_v56 = vmul.f32 %v1775_v21, %v2270_v23  ;;  %v1206_v28 = vor.u32 1.1754944e-38, %v1205_v20  ;;  %v980_v20 = vld [vmem:[%s1997_s22 + $0x20] sm:$0x3] }
  0xa1   : > { %631 = vxpose.xlu2.b32.start.end [1/1] (short) (narrow) %v630_v9, 16  ;;  %v1777_v25 = vpop.eup %1776  ;;  %v1202_v13 = vsel %vm1201_vm4, %v2219_v36, %v1198_v41  ;;  %vm1204_vm5 = vcmp.eq.f32.partialorder %v1203_v24, 8.507059e+37  ;;  %1780 = vpow2.f32 %v1686_v26  ;;  %v1692_v43 = vmul.f32 -1.442695, %v1166_v35 }
  0xa2   : > { %v883_v49 = vsel %vm544_vm15, %v882_v12, %v880_v14  ;;  %v715_v31 = vmul.f32 %v1777_v25, %v2252_v42  ;;  %v1207_v32 = vsel %vm1204_vm5, %v1206_v28, %v1202_v13  ;;  %v1284_v8 = vsel %vm542_vm14, %v1134_v27, %v1158_v56  ;;  %v1102_v27 = vld.sshfl [vmem:[#allocation1 + $0x20] sm:$0xff pattern:$0x73625140] }
  0xa3   : > { %884 = vxpose.xlu1.b32.start.end [1/1] (short) (narrow) %v883_v49, 64  ;;  %v1779_v30 = vpop.eup %1778  ;;  %v1286_v34 = vsel %vm544_vm15, %v1284_v8, %v1207_v32  ;;  %v757_v44 = vmul.f32 1.442695, %v752_v38  ;;  %vm719_vm6 = vweird.f32 %v2252_v42  ;;  %vm720_vm7 = vweird.f32 %v1777_v25 }
  0xa4   : > { %v782_v62 = vadd.f32 1.0, %v1779_v30  ;;  %v716_v33 = vsub.f32 1.0, %v715_v31  ;;  %v725_v48 = vand.u32 2147483648, %v2252_v42  ;;  %v723_v50 = vand.u32 2147483647, %v2252_v42  ;;  %vm721_vm8 = vmor %vm719_vm6, %vm720_vm7 }
  0xa5   : > { %v761_v59 = vrot.slane %v745_v55, 2  ;;  %v1688_v24 = vmul.f32 -1.442695, %v980_v20 }
  0xa6   : > { %1782 = vrcp.f32 %v782_v62  ;;  %v717_v40 = vmul.f32 %v1777_v25, %v716_v33  ;;  %v726_v52 = vor.u32 1.1754944e-38, %v725_v48  ;;  %vm724_vm9 = vcmp.eq.f32.partialorder %v723_v50, 8.507059e+37  ;;  %v1168_v33 = vld [vmem:[%s1997_s22 + $0x20] sm:$0xf0] }
  0xa7   : > { %v1781_v39 = vpop.eup %1780  ;;  %1784 = vpow2.f32 %v1692_v43  ;;  %vm818_vm10 = vweird.f32 %v782_v62  ;;  %v824_v60 = vand.u32 2147483648, %v782_v62  ;;  %v822_v6 = vand.u32 2147483647, %v782_v62 }
  0xa8   : > { %v1002_v45 = vadd.f32 1.0, %v1781_v39  ;;  %v718_v29 = vadd.f32 %v1777_v25, %v717_v40  ;;  %1786 = vpow2.f32 %v757_v44  ;;  %v1694_v40 = vmul.f32 -1.442695, %v1168_v33 }
  0xa9   : > { %v825_v3 = vor.u32 1.1754944e-38, %v824_v60  ;;  %vm823_vm13 = vcmp.eq.f32.partialorder %v822_v6, 8.507059e+37 }
  0xaa   : > { %1788 = vrcp.f32 %v1002_v45  ;;  %v722_v54 = vsel %vm721_vm8, %v1777_v25, %v718_v29  ;;  %vm1041_vm0 = vweird.f32 %v1002_v45  ;;  %v1047_v17 = vand.u32 2147483648, %v1002_v45 }
  0xab   : > { %v727_v46 = vsel %vm724_vm9, %v726_v52, %v722_v54  ;;  %v1045_v19 = vand.u32 2147483647, %v1002_v45 }
  0xac   : > { %v1783_v36 = vpop.eup %1782  ;;  %v731_v11 = vadd.f32 %v727_v46, %v2136_v22  ;;  %v1142_v22 = vld [vmem:[%s1997_s22 + $0x10] sm:$0xc]  ;;  %v1048_v41 = vor.u32 1.1754944e-38, %v1047_v17 }
  0xad   : > { %v814_v47 = vmul.f32 %v1783_v36, %v782_v62  ;;  %vm819_vm11 = vweird.f32 %v1783_v36  ;;  %v1785_v58 = vpop.eup %1784  ;;  %v1150_v21 = vmul.f32 1.442695, %v1142_v22  ;;  %vm1046_vm3 = vcmp.eq.f32.partialorder %v1045_v19, 8.507059e+37  ;;  %v2290_v62 = vpop.permute.xlu0 %1126 }
  0xae   : > { %v1787_v61 = vpop.eup %1786  ;;  %vm820_vm12 = vmor %vm818_vm10, %vm819_vm11  ;;  %v1190_v1 = vadd.f32 1.0, %v1785_v58  ;;  %v749_v37 = vmul.f32 %v745_v55, %v731_v11 }
  0xaf   : > { %v815_v51 = vsub.f32 1.0, %v814_v47  ;;  %v767_v2 = vmul.f32 %v1787_v61, %v761_v59  ;;  %v1144_v59 = vld [vmem:[%s1997_s22 + $0x20] sm:$0xc] }
  0xb0   : > { %v1789_v0 = vpop.eup %1788  ;;  %1790 = vrcp.f32 %v1190_v1  ;;  %vm1229_vm4 = vweird.f32 %v1190_v1  ;;  %v1235_v30 = vand.u32 2147483648, %v1190_v1  ;;  %v1233_v8 = vand.u32 2147483647, %v1190_v1 }
  0xb1   : > { %1288 = vxpose.xlu2.b32.start.end [1/1] (short) %v1286_v34, 128  ;;  %v816_v53 = vmul.f32 %v1783_v36, %v815_v51  ;;  %v1037_v4 = vmul.f32 %v1789_v0, %v1002_v45  ;;  %v925_v5 = vrot.slane %v767_v2, 6  ;;  %vm1042_vm1 = vweird.f32 %v1789_v0  ;;  %v1165_v2 = vld [vmem:[%s1997_s22 + $0x8] sm:$0xf0] }
  0xb2   : > { %vm1043_vm2 = vmor %vm1041_vm0, %vm1042_vm1  ;;  %1792 = vpow2.f32 %v1150_v21  ;;  %v1236_v39 = vor.u32 1.1754944e-38, %v1235_v30  ;;  %vm1234_vm7 = vcmp.eq.f32.partialorder %v1233_v8, 8.507059e+37  ;;  %v1154_v6 = vmul.f32 1.442695, %v1144_v59 }
  0xb3   : > { %v817_v63 = vadd.f32 %v1783_v36, %v816_v53  ;;  %v1038_v9 = vsub.f32 1.0, %v1037_v4  ;;  %v930_v12 = vsel %vm542_vm14, %v749_v37, %v925_v5  ;;  %1794 = vpow2.f32 %v1688_v24  ;;  %v977_v53 = vld [vmem:[%s1997_s22 + $0x8] sm:$0x3] }
  0xb4   : > { %1796 = vpow2.f32 %v1694_v40  ;;  %v1685_v58 = vmul.f32 -1.442695, %v977_v53  ;;  %v1691_v5 = vmul.f32 -1.442695, %v1165_v2 }
  0xb5   : > { %v821_v42 = vsel %vm820_vm12, %v1783_v36, %v817_v63  ;;  %v1039_v15 = vmul.f32 %v1789_v0, %v1038_v9 }
  0xb6   : > { %v826_v7 = vsel %vm823_vm13, %v825_v3, %v821_v42  ;;  %v1791_v14 = vpop.eup %1790  ;;  %v1105_v3 = vld.sshfl [vmem:[#allocation1] sm:$0xff pattern:$0x73625140] }
  0xb7   : > { %v928_v10 = vrot.slane %v826_v7, 4  ;;  %v1225_v49 = vmul.f32 %v1791_v14, %v1190_v1  ;;  %v1040_v18 = vadd.f32 %v1789_v0, %v1039_v15  ;;  %vm1230_vm5 = vweird.f32 %v1791_v14 }
  0xb8   : > { %v1793_v31 = vpop.eup %1792  ;;  %vm1231_vm6 = vmor %vm1229_vm4, %vm1230_vm5  ;;  %vm578_vm5 = vcmask 64512  }
  0xb9   : > { %v931_v16 = vsel %vm544_vm15, %v930_v12, %v928_v10  ;;  %v1226_v25 = vsub.f32 1.0, %v1225_v49  ;;  %v1044_v26 = vsel %vm1043_vm2, %v1789_v0, %v1040_v18  ;;  %v1795_v34 = vpop.eup %1794  ;;  %v1160_v38 = vmul.f32 %v1793_v31, %v2290_v62 }
  0xba   : > { %v1049_v56 = vsel %vm1046_vm3, %v1048_v41, %v1044_v26  ;;  %v1004_v36 = vadd.f32 1.0, %v1795_v34  ;;  %v1797_v48 = vpop.eup %1796 }
  0xbb   : > { %v1227_v28 = vmul.f32 %v1791_v14, %v1226_v25  ;;  %v1115_v13 = vadd.f32 %v1102_v27, %v1049_v56  ;;  %v1192_v50 = vadd.f32 1.0, %v1797_v48 }
  0xbc   : > { %1798 = vrcp.f32 %v1004_v36  ;;  %vm1071_vm8 = vweird.f32 %v1004_v36  ;;  %v1077_v60 = vand.u32 2147483648, %v1004_v36  ;;  %v1075_v63 = vand.u32 2147483647, %v1004_v36 }
  0xbd   : > { %v1228_v32 = vadd.f32 %v1791_v14, %v1227_v28  ;;  %v1136_v35 = vmul.f32 %v2290_v62, %v1115_v13  ;;  %1800 = vrcp.f32 %v1192_v50  ;;  %vm1259_vm12 = vweird.f32 %v1192_v50  ;;  %v1141_v13 = vld [vmem:[%s1997_s22 + $0x8] sm:$0xc] }
  0xbe   : > { %1802 = vpow2.f32 %v1685_v58  ;;  %v1078_v0 = vor.u32 1.1754944e-38, %v1077_v60  ;;  %vm1076_vm11 = vcmp.eq.f32.partialorder %v1075_v63, 8.507059e+37  ;;  %v1265_v9 = vand.u32 2147483648, %v1192_v50  ;;  %v1167_v60 = vld [vmem:[%s1997_s22 + $0x18] sm:$0xf0] }
  0xbf   : > { %v1232_v43 = vsel %vm1231_vm6, %v1791_v14, %v1228_v32  ;;  %v1384_v45 = vsel %vm542_vm14, %v1136_v35, %v1160_v38  ;;  %1804 = vpow2.f32 %v1154_v6  ;;  %v2300_v14 = vpop.permute.xlu2 %1131  ;;  %v1263_v22 = vand.u32 2147483647, %v1192_v50 }
  0xc0   : > { %v1237_v44 = vsel %vm1234_vm7, %v1236_v39, %v1232_v43  ;;  %1806 = vpow2.f32 %v1691_v5  ;;  %v1266_v49 = vor.u32 1.1754944e-38, %v1265_v9  ;;  %v1148_v33 = vmul.f32 1.442695, %v1141_v13  ;;  %v1143_v5 = vld [vmem:[%s1997_s22 + $0x18] sm:$0xc] }
  0xc1   : > { %v1386_v47 = vsel %vm544_vm15, %v1384_v45, %v1237_v44  ;;  %vm1264_vm1 = vcmp.eq.f32.partialorder %v1263_v22, 8.507059e+37  ;;  %v979_v44 = vld [vmem:[%s1997_s22 + $0x18] sm:$0x3] }
  0xc2   : > { %v1799_v29 = vpop.eup %1798 }
  0xc3   : > { %v1067_v51 = vmul.f32 %v1799_v29, %v1004_v36  ;;  %v1801_v54 = vpop.eup %1800  ;;  %vm1072_vm9 = vweird.f32 %v1799_v29 }
  0xc4   : > { %v1255_v61 = vmul.f32 %v1801_v54, %v1192_v50  ;;  %vm1073_vm10 = vmor %vm1071_vm8, %vm1072_vm9  ;;  %v1803_v37 = vpop.eup %1802  ;;  %vm1260_vm13 = vweird.f32 %v1801_v54 }
  0xc5   : > { %v1068_v52 = vsub.f32 1.0, %v1067_v51  ;;  %v1805_v10 = vpop.eup %1804  ;;  %v1001_v12 = vadd.f32 1.0, %v1803_v37  ;;  %vm1261_vm0 = vmor %vm1259_vm12, %vm1260_vm13  ;;  %v1687_v51 = vmul.f32 -1.442695, %v979_v44 }
  0xc6   : > { %v1256_v1 = vsub.f32 1.0, %v1255_v61  ;;  %v1162_v17 = vmul.f32 %v1805_v10, %v2300_v14  ;;  %v1807_v21 = vpop.eup %1806 }
  0xc7   : > { %v1069_v55 = vmul.f32 %v1799_v29, %v1068_v52  ;;  %1808 = vrcp.f32 %v1001_v12  ;;  %v1189_v25 = vadd.f32 1.0, %v1807_v21  ;;  %vm1026_vm2 = vweird.f32 %v1001_v12 }
  0xc8   : > { %v1257_v42 = vmul.f32 %v1801_v54, %v1256_v1  ;;  %v1032_v30 = vand.u32 2147483648, %v1001_v12  ;;  %v1030_v8 = vand.u32 2147483647, %v1001_v12 }
  0xc9   : > { %v1070_v46 = vadd.f32 %v1799_v29, %v1069_v55  ;;  %1810 = vrcp.f32 %v1189_v25  ;;  %vm1214_vm7 = vweird.f32 %v1189_v25  ;;  %v1220_v45 = vand.u32 2147483648, %v1189_v25 }
  0xca   : > { %v1258_v15 = vadd.f32 %v1801_v54, %v1257_v42  ;;  %v1033_v34 = vor.u32 1.1754944e-38, %v1032_v30  ;;  %vm1031_vm6 = vcmp.eq.f32.partialorder %v1030_v8, 8.507059e+37  ;;  %1812 = vpow2.f32 %v1148_v33 }
  0xcb   : > { %v1074_v11 = vsel %vm1073_vm10, %v1799_v29, %v1070_v46  ;;  %v1218_v29 = vand.u32 2147483647, %v1189_v25  ;;  %1814 = vpow2.f32 %v1687_v51  ;;  %v1693_v46 = vmul.f32 -1.442695, %v1167_v60 }
  0xcc   : > { %v1079_v4 = vsel %vm1076_vm11, %v1078_v0, %v1074_v11  ;;  %v1262_v18 = vsel %vm1261_vm0, %v1801_v54, %v1258_v15  ;;  %v1221_v54 = vor.u32 1.1754944e-38, %v1220_v45  ;;  %v1152_v15 = vmul.f32 1.442695, %v1143_v5 }
  0xcd   : > { %v1117_v7 = vadd.f32 %v1105_v3, %v1079_v4  ;;  %v1267_v19 = vsel %vm1264_vm1, %v1266_v49, %v1262_v18  ;;  %v1809_v41 = vpop.eup %1808  ;;  %vm1219_vm10 = vcmp.eq.f32.partialorder %v1218_v29, 8.507059e+37  ;;  %1816 = vpow2.f32 %v1693_v46  ;;  %v1103_v18 = vld.sshfl [vmem:[#allocation1 + $0x28] sm:$0xff pattern:$0x73625140] }
  0xce   : > { %v1022_v26 = vmul.f32 %v1809_v41, %v1001_v12  ;;  %vm1027_vm3 = vweird.f32 %v1809_v41 }
  0xcf   : > { %v1811_v56 = vpop.eup %1810  ;;  %vm1028_vm4 = vmor %vm1026_vm2, %vm1027_vm3 }
  0xd0   : > { %v1023_v27 = vsub.f32 1.0, %v1022_v26  ;;  %v1210_v31 = vmul.f32 %v1811_v56, %v1189_v25  ;;  %vm1215_vm8 = vweird.f32 %v1811_v56 }
  0xd1   : > { %vm1216_vm9 = vmor %vm1214_vm7, %vm1215_vm8 }
  0xd2   : > { %v1024_v28 = vmul.f32 %v1809_v41, %v1023_v27  ;;  %v1211_v38 = vsub.f32 1.0, %v1210_v31 }
  0xd4   : > { %v1025_v32 = vadd.f32 %v1809_v41, %v1024_v28  ;;  %v1212_v43 = vmul.f32 %v1811_v56, %v1211_v38 }
  0xd6   : > { %v1029_v39 = vsel %vm1028_vm4, %v1809_v41, %v1025_v32  ;;  %v1213_v48 = vadd.f32 %v1811_v56, %v1212_v43 }
  0xd7   : > { %v1034_v40 = vsel %vm1031_vm6, %v1033_v34, %v1029_v39  ;;  %v981_v39 = vld [vmem:[%s1997_s22 + $0x28] sm:$0x3] }
  0xd8   : > { %932 = vxpose.xlu0.b32.start.end [1/1] (short) (narrow) %v931_v16, 64  ;;  %v1138_v16 = vmul.f32 %v2300_v14, %v1117_v7  ;;  %v1114_v36 = vadd.f32 %v2003_v57, %v1034_v40  ;;  %v1217_v55 = vsel %vm1216_vm9, %v1811_v56, %v1213_v48 }
  0xd9   : > { %v1222_v57 = vsel %vm1219_vm10, %v1221_v54, %v1217_v55 }
  0xda   : > { %v1484_v20 = vsel %vm542_vm14, %v1138_v16, %v1162_v17  ;;  %v1135_v52 = vmul.f32 %v2270_v23, %v1114_v36  ;;  %v1689_v36 = vmul.f32 -1.442695, %v981_v39 }
  0xdb   : > { %v1486_v24 = vsel %vm544_vm15, %v1484_v20, %v1267_v19 }
  0xe3   : > { %1388 = vxpose.xlu1.b32.start.end [1/1] (short) %v1386_v47, 128  ;;  %v1813_v47 = vpop.eup %1812 }
  0xe4   : > { %v1159_v53 = vmul.f32 %v1813_v47, %v2270_v23  ;;  %v1815_v61 = vpop.eup %1814  ;;  %v1169_v47 = vld [vmem:[%s1997_s22 + $0x28] sm:$0xf0] }
  0xe5   : > { %v1003_v63 = vadd.f32 1.0, %v1815_v61  ;;  %v1817_v6 = vpop.eup %1816  ;;  %v1695_v29 = vmul.f32 -1.442695, %v1169_v47 }
  0xe6   : > { %v1285_v58 = vsel %vm542_vm14, %v1135_v52, %v1159_v53  ;;  %v1191_v1 = vadd.f32 1.0, %v1817_v6  ;;  %v1145_v6 = vld [vmem:[%s1997_s22 + $0x28] sm:$0xc] }
  0xe7   : > { %v1287_v59 = vsel %vm544_vm15, %v1285_v58, %v1222_v57  ;;  %1818 = vrcp.f32 %v1003_v63  ;;  %vm1056_vm11 = vweird.f32 %v1003_v63  ;;  %v1062_v7 = vand.u32 2147483648, %v1003_v63 }
  0xe8   : > { %1820 = vrcp.f32 %v1191_v1  ;;  %v1060_v12 = vand.u32 2147483647, %v1003_v63  ;;  %vm1244_vm1 = vweird.f32 %v1191_v1  ;;  %v1250_v41 = vand.u32 2147483648, %v1191_v1 }
  0xe9   : > { %v1063_v22 = vor.u32 1.1754944e-38, %v1062_v7  ;;  %1822 = vpow2.f32 %v1152_v15  ;;  %v1248_v26 = vand.u32 2147483647, %v1191_v1 }
  0xea   : > { %vm1061_vm0 = vcmp.eq.f32.partialorder %v1060_v12, 8.507059e+37  ;;  %v1251_v30 = vor.u32 1.1754944e-38, %v1250_v41  ;;  %1824 = vpow2.f32 %v1689_v36 }
  0xeb   : > { %vm1249_vm4 = vcmp.eq.f32.partialorder %v1248_v26, 8.507059e+37  ;;  %1826 = vpow2.f32 %v1695_v29 }
  0xed   : > { %v1819_v0 = vpop.eup %1818 }
  0xee   : > { %v1052_v11 = vmul.f32 %v1819_v0, %v1003_v63  ;;  %v1821_v4 = vpop.eup %1820  ;;  %vm1057_vm12 = vweird.f32 %v1819_v0 }
  0xef   : > { %v1240_v9 = vmul.f32 %v1821_v4, %v1191_v1  ;;  %vm1058_vm13 = vmor %vm1056_vm11, %vm1057_vm12  ;;  %vm1245_vm2 = vweird.f32 %v1821_v4 }
  0xf0   : > { %v1053_v3 = vsub.f32 1.0, %v1052_v11  ;;  %vm1246_vm3 = vmor %vm1244_vm1, %vm1245_vm2 }
  0xf1   : > { %v1241_v16 = vsub.f32 1.0, %v1240_v9  ;;  %v1106_v9 = vld.sshfl [vmem:[#allocation1 + $0x8] sm:$0xff pattern:$0x73625140] }
  0xf2   : > { %v1054_v42 = vmul.f32 %v1819_v0, %v1053_v3 }
  0xf3   : > { %v1242_v20 = vmul.f32 %v1821_v4, %v1241_v16 }
  0xf4   : > { %v1055_v10 = vadd.f32 %v1819_v0, %v1054_v42  ;;  %v1156_v42 = vmul.f32 1.442695, %v1145_v6 }
  0xf5   : > { %v1243_v25 = vadd.f32 %v1821_v4, %v1242_v20 }
  0xf6   : > { %v1059_v17 = vsel %vm1058_vm13, %v1819_v0, %v1055_v10 }
  0xf7   : > { %v1064_v19 = vsel %vm1061_vm0, %v1063_v22, %v1059_v17  ;;  %v1247_v31 = vsel %vm1246_vm3, %v1821_v4, %v1243_v25 }
  0xf8   : > { %v1116_v21 = vadd.f32 %v1103_v18, %v1064_v19  ;;  %v1252_v32 = vsel %vm1249_vm4, %v1251_v30, %v1247_v31 }
  0xfa   : > { %v1137_v28 = vmul.f32 %v2290_v62, %v1116_v21 }
 0x118   : > { %1488 = vxpose.xlu0.b32.start.end [1/1] (short) %v1486_v24, 128  ;;  %v1823_v24 = vpop.eup %1822 }
 0x119   : > { %v1161_v13 = vmul.f32 %v1823_v24, %v2290_v62  ;;  %v1825_v48 = vpop.eup %1824 }
 0x11a   : > { %v1827_v53 = vpop.eup %1826 }
 0x11b   : > { %v1385_v8 = vsel %vm542_vm14, %v1137_v28, %v1161_v13  ;;  %v1193_v58 = vadd.f32 1.0, %v1827_v53 }
 0x11c   : > { %v1387_v34 = vsel %vm544_vm15, %v1385_v8, %v1252_v32 }
 0x11d   : > { %vm1274_vm10 = vweird.f32 %v1193_v58  ;;  %v1278_v20 = vand.u32 2147483647, %v1193_v58 }
 0x11f   : > { %vm1279_vm13 = vcmp.eq.f32.partialorder %v1278_v20, 8.507059e+37 }
 0x129   : > { %v605_v35 = vpop.trf.xlu2 }
 0x12a   : > { %621 = vst.msk [vmem:[%s2311_s11 + $0x10] sm:$0xff] %vm578_vm5, %v605_v35 }
 0x12c   : > { %v562_v56 = vpop.trf.xlu1 }
 0x12d   : > { %579 = vst.msk [vmem:[%s2311_s11] sm:$0xff] %vm578_vm5, %v562_v56 }
 0x131   : > { %v606_v50 = vpop.trf.xlu2  ;;  %1320 = vxpose.xlu2.b32.start.end [1/1] (short) %v1287_v59, 128 }
 0x132   : > { %622 = vst.msk [vmem:[%s2311_s11 + $0x18] sm:$0xff] %vm578_vm5, %v606_v50  ;;  %v1005_v50 = vadd.f32 1.0, %v1825_v48 }
 0x134   : > { %v563_v35 = vpop.trf.xlu1  ;;  %1828 = vrcp.f32 %v1005_v50  ;;  %vm1086_vm6 = vweird.f32 %v1005_v50  ;;  %v1092_v0 = vand.u32 2147483648, %v1005_v50  ;;  %v1090_v3 = vand.u32 2147483647, %v1005_v50 }
 0x135   : > { %580 = vst.msk [vmem:[%s2311_s11 + $0x8] sm:$0xff] %vm578_vm5, %v563_v35  ;;  %1830 = vrcp.f32 %v1193_v58 }
 0x136   : > { %vm1091_vm9 = vcmp.eq.f32.partialorder %v1090_v3, 8.507059e+37  ;;  %1832 = vpow2.f32 %v1156_v42 }
 0x13a   : > { %v647_v23 = vpop.trf.xlu2  ;;  %v1829_v57 = vpop.eup %1828 }
 0x13b   : > { %663 = vst.msk [vmem:[%s2311_s11 + $0x20] sm:$0xff] %vm578_vm5, %v647_v23  ;;  %v1082_v59 = vmul.f32 %v1829_v57, %v1005_v50  ;;  %v1831_v63 = vpop.eup %1830  ;;  %vm1087_vm7 = vweird.f32 %v1829_v57 }
 0x13c   : > { %v1270_v11 = vmul.f32 %v1831_v63, %v1193_v58  ;;  %vm1088_vm8 = vmor %vm1086_vm6, %vm1087_vm7  ;;  %v852_v16 = vpop.trf.xlu0  ;;  %vm1275_vm11 = vweird.f32 %v1831_v63  ;;  %v1833_v18 = vpop.eup %1832 }
 0x13d   : > { %v1083_v61 = vsub.f32 1.0, %v1082_v59  ;;  %868 = vst.msk [vmem:[%s2311_s11 + $0x30] sm:$0xff] %vm578_vm5, %v852_v16  ;;  %vm1276_vm12 = vmor %vm1274_vm10, %vm1275_vm11  ;;  %v1163_v41 = vmul.f32 %v1833_v18, %v2300_v14 }
 0x13e   : > { %v1271_v5 = vsub.f32 1.0, %v1270_v11 }
 0x13f   : > { %v1084_v23 = vmul.f32 %v1829_v57, %v1083_v61 }
 0x140   : > { %v1272_v15 = vmul.f32 %v1831_v63, %v1271_v5 }
 0x142   : > { %v648_v2 = vpop.trf.xlu2  ;;  %v1273_v19 = vadd.f32 %v1831_v63, %v1272_v15 }
 0x143   : > { %664 = vst.msk [vmem:[%s2311_s11 + $0x28] sm:$0xff] %vm578_vm5, %v648_v2  ;;  %v1085_v2 = vadd.f32 %v1829_v57, %v1084_v23 }
 0x144   : > { %v1277_v26 = vsel %vm1276_vm12, %v1831_v63, %v1273_v19  ;;  %v853_v56 = vpop.trf.xlu0 }
 0x145   : > { %v1089_v7 = vsel %vm1088_vm8, %v1829_v57, %v1085_v2  ;;  %869 = vst.msk [vmem:[%s2311_s11 + $0x38] sm:$0xff] %vm578_vm5, %v853_v56 }
 0x147   : > { %v900_v38 = vpop.trf.xlu1 }
 0x148   : > { %916 = vst.msk [vmem:[%s2311_s11 + $0x70] sm:$0xff] %vm578_vm5, %v900_v38 }
 0x14a   : > { %v1304_v37 = vpop.trf.xlu2 }
 0x14b   : > { %1352 = vst.msk [vmem:[%s2311_s11 + $0xf0] sm:$0xff] %vm578_vm5, %v1304_v37  ;;  %v1093_v37 = vor.u32 1.1754944e-38, %v1092_v0 }
 0x14c   : > { %v854_v32 = vpop.trf.xlu0 }
 0x14d   : > { %v1094_v10 = vsel %vm1091_vm9, %v1093_v37, %v1089_v7  ;;  %870 = vst.msk [vmem:[%s2311_s11 + $0x40] sm:$0xff] %vm578_vm5, %v854_v32 }
 0x14e   : > { %v1118_v17 = vadd.f32 %v1106_v9, %v1094_v10 }
 0x14f   : > { %v901_v43 = vpop.trf.xlu1 }
 0x150   : > { %917 = vst.msk [vmem:[%s2311_s11 + $0x78] sm:$0xff] %vm578_vm5, %v901_v43  ;;  %v1139_v21 = vmul.f32 %v2300_v14, %v1118_v17 }
 0x152   : > { %v1305_v49 = vpop.trf.xlu2  ;;  %v1485_v13 = vsel %vm542_vm14, %v1139_v21, %v1163_v41 }
 0x153   : > { %1353 = vst.msk [vmem:[%s2311_s11 + $0xf8] sm:$0xff] %vm578_vm5, %v1305_v49  ;;  %v1280_v49 = vand.u32 2147483648, %v1193_v58 }
 0x155   : > { %v1281_v24 = vor.u32 1.1754944e-38, %v1280_v49 }
 0x157   : > { %v902_v45 = vpop.trf.xlu1  ;;  %v1282_v28 = vsel %vm1279_vm13, %v1281_v24, %v1277_v26 }
 0x158   : > { %918 = vst.msk [vmem:[%s2311_s11 + $0x80] sm:$0xff] %vm578_vm5, %v902_v45  ;;  %v1487_v14 = vsel %vm544_vm15, %v1485_v13, %v1282_v28 }
 0x15a   : > { %v1306_v27 = vpop.trf.xlu2 }
 0x15b   : > { %1354 = vst.msk [vmem:[%s2311_s11 + $0x100] sm:$0xff] %vm578_vm5, %v1306_v27 }
 0x15f   : > { %v903_v52 = vpop.trf.xlu1 }
 0x160   : > { %919 = vst.msk [vmem:[%s2311_s11 + $0x88] sm:$0xff] %vm578_vm5, %v903_v52 }
 0x162   : > { %v1307_v33 = vpop.trf.xlu2 }
 0x163   : > { %1355 = vst.msk [vmem:[%s2311_s11 + $0x108] sm:$0xff] %vm578_vm5, %v1307_v33  ;;  %1420 = vxpose.xlu1.b32.start.end [1/1] (short) %v1387_v34, 128  ;;  %v855_v34 = vpop.trf.xlu0 }
 0x164   : > { %871 = vst.msk [vmem:[%s2311_s11 + $0x48] sm:$0xff] %vm578_vm5, %v855_v34 }
 0x167   : > { %v904_v55 = vpop.trf.xlu1 }
 0x168   : > { %920 = vst.msk [vmem:[%s2311_s11 + $0x90] sm:$0xff] %vm578_vm5, %v904_v55 }
 0x16a   : > { %v1308_v62 = vpop.trf.xlu2 }
 0x16b   : > { %1356 = vst.msk [vmem:[%s2311_s11 + $0x110] sm:$0xff] %vm578_vm5, %v1308_v62  ;;  %v856_v38 = vpop.trf.xlu0 }
 0x16c   : > { %872 = vst.msk [vmem:[%s2311_s11 + $0x50] sm:$0xff] %vm578_vm5, %v856_v38 }
 0x16f   : > { %v905_v46 = vpop.trf.xlu1 }
 0x170   : > { %921 = vst.msk [vmem:[%s2311_s11 + $0x98] sm:$0xff] %vm578_vm5, %v905_v46 }
 0x172   : > { %v1309_v40 = vpop.trf.xlu2 }
 0x173   : > { %1357 = vst.msk [vmem:[%s2311_s11 + $0x118] sm:$0xff] %vm578_vm5, %v1309_v40  ;;  %v857_v43 = vpop.trf.xlu0 }
 0x174   : > { %873 = vst.msk [vmem:[%s2311_s11 + $0x58] sm:$0xff] %vm578_vm5, %v857_v43 }
 0x177   : > { %v906_v4 = vpop.trf.xlu1 }
 0x178   : > { %922 = vst.msk [vmem:[%s2311_s11 + $0xa0] sm:$0xff] %vm578_vm5, %v906_v4 }
 0x17a   : > { %v1310_v44 = vpop.trf.xlu2 }
 0x17b   : > { %1358 = vst.msk [vmem:[%s2311_s11 + $0x120] sm:$0xff] %vm578_vm5, %v1310_v44  ;;  %v858_v45 = vpop.trf.xlu0 }
 0x17c   : > { %874 = vst.msk [vmem:[%s2311_s11 + $0x60] sm:$0xff] %vm578_vm5, %v858_v45 }
 0x17f   : > { %v907_v22 = vpop.trf.xlu1 }
 0x180   : > { %923 = vst.msk [vmem:[%s2311_s11 + $0xa8] sm:$0xff] %vm578_vm5, %v907_v22 }
 0x182   : > { %v1311_v51 = vpop.trf.xlu2 }
 0x183   : > { %1359 = vst.msk [vmem:[%s2311_s11 + $0x128] sm:$0xff] %vm578_vm5, %v1311_v51  ;;  %v859_v29 = vpop.trf.xlu0 }
 0x184   : > { %875 = vst.msk [vmem:[%s2311_s11 + $0x68] sm:$0xff] %vm578_vm5, %v859_v29 }
 0x187   : > { %v1404_v27 = vpop.trf.xlu1 }
 0x188   : > { %1452 = vst.msk [vmem:[%s2311_s11 + $0x1f0] sm:$0xff] %vm578_vm5, %v1404_v27 }
 0x18a   : > { %v1312_v54 = vpop.trf.xlu2 }
 0x18b   : > { %1360 = vst.msk [vmem:[%s2311_s11 + $0x130] sm:$0xff] %vm578_vm5, %v1312_v54  ;;  %v948_v52 = vpop.trf.xlu0 }
 0x18c   : > { %964 = vst.msk [vmem:[%s2311_s11 + $0xb0] sm:$0xff] %vm578_vm5, %v948_v52 }
 0x18f   : > { %v1405_v31 = vpop.trf.xlu1 }
 0x190   : > { %1453 = vst.msk [vmem:[%s2311_s11 + $0x1f8] sm:$0xff] %vm578_vm5, %v1405_v31 }
 0x192   : > { %v1313_v60 = vpop.trf.xlu2 }
 0x193   : > { %1361 = vst.msk [vmem:[%s2311_s11 + $0x138] sm:$0xff] %vm578_vm5, %v1313_v60  ;;  %v949_v55 = vpop.trf.xlu0 }
 0x194   : > { %965 = vst.msk [vmem:[%s2311_s11 + $0xb8] sm:$0xff] %vm578_vm5, %v949_v55 }
 0x197   : > { %v1406_v33 = vpop.trf.xlu1 }
 0x198   : > { %1454 = vst.msk [vmem:[%s2311_s11 + $0x200] sm:$0xff] %vm578_vm5, %v1406_v33 }
 0x19a   : > { %v1314_v1 = vpop.trf.xlu2 }
 0x19b   : > { %1362 = vst.msk [vmem:[%s2311_s11 + $0x140] sm:$0xff] %vm578_vm5, %v1314_v1  ;;  %v950_v59 = vpop.trf.xlu0 }
 0x19c   : > { %966 = vst.msk [vmem:[%s2311_s11 + $0xc0] sm:$0xff] %vm578_vm5, %v950_v59 }
 0x19f   : > { %v1407_v62 = vpop.trf.xlu1 }
 0x1a0   : > { %1455 = vst.msk [vmem:[%s2311_s11 + $0x208] sm:$0xff] %vm578_vm5, %v1407_v62 }
 0x1a2   : > { %v1315_v12 = vpop.trf.xlu2 }
 0x1a3   : > { %1363 = vst.msk [vmem:[%s2311_s11 + $0x148] sm:$0xff] %vm578_vm5, %v1315_v12  ;;  %v951_v46 = vpop.trf.xlu0 }
 0x1a4   : > { %967 = vst.msk [vmem:[%s2311_s11 + $0xc8] sm:$0xff] %vm578_vm5, %v951_v46 }
 0x1a7   : > { %v1408_v40 = vpop.trf.xlu1 }
 0x1a8   : > { %1456 = vst.msk [vmem:[%s2311_s11 + $0x210] sm:$0xff] %vm578_vm5, %v1408_v40 }
 0x1aa   : > { %v1316_v25 = vpop.trf.xlu2 }
 0x1ab   : > { %1364 = vst.msk [vmem:[%s2311_s11 + $0x150] sm:$0xff] %vm578_vm5, %v1316_v25  ;;  %v952_v6 = vpop.trf.xlu0 }
 0x1ac   : > { %968 = vst.msk [vmem:[%s2311_s11 + $0xd0] sm:$0xff] %vm578_vm5, %v952_v6 }
 0x1af   : > { %v1409_v44 = vpop.trf.xlu1 }
 0x1b0   : > { %1457 = vst.msk [vmem:[%s2311_s11 + $0x218] sm:$0xff] %vm578_vm5, %v1409_v44 }
 0x1b1   : > { %1520 = vxpose.xlu2.b32.start.end [1/1] (short) %v1487_v14, 128 }
 0x1b2   : > { %v1317_v30 = vpop.trf.xlu2 }
 0x1b3   : > { %1365 = vst.msk [vmem:[%s2311_s11 + $0x158] sm:$0xff] %vm578_vm5, %v1317_v30  ;;  %v953_v11 = vpop.trf.xlu0 }
 0x1b4   : > { %969 = vst.msk [vmem:[%s2311_s11 + $0xd8] sm:$0xff] %vm578_vm5, %v953_v11 }
 0x1b7   : > { %v1410_v48 = vpop.trf.xlu1 }
 0x1b8   : > { %1458 = vst.msk [vmem:[%s2311_s11 + $0x220] sm:$0xff] %vm578_vm5, %v1410_v48 }
 0x1ba   : > { %v1318_v8 = vpop.trf.xlu2 }
 0x1bb   : > { %1366 = vst.msk [vmem:[%s2311_s11 + $0x160] sm:$0xff] %vm578_vm5, %v1318_v8  ;;  %v954_v4 = vpop.trf.xlu0 }
 0x1bc   : > { %970 = vst.msk [vmem:[%s2311_s11 + $0xe0] sm:$0xff] %vm578_vm5, %v954_v4 }
 0x1bf   : > { %v1411_v51 = vpop.trf.xlu1 }
 0x1c0   : > { %1459 = vst.msk [vmem:[%s2311_s11 + $0x228] sm:$0xff] %vm578_vm5, %v1411_v51 }
 0x1c2   : > { %v1319_v35 = vpop.trf.xlu2 }
 0x1c3   : > { %1367 = vst.msk [vmem:[%s2311_s11 + $0x168] sm:$0xff] %vm578_vm5, %v1319_v35  ;;  %v955_v5 = vpop.trf.xlu0 }
 0x1c4   : > { %971 = vst.msk [vmem:[%s2311_s11 + $0xe8] sm:$0xff] %vm578_vm5, %v955_v5 }
 0x1c7   : > { %v1412_v54 = vpop.trf.xlu1 }
 0x1c8   : > { %1460 = vst.msk [vmem:[%s2311_s11 + $0x230] sm:$0xff] %vm578_vm5, %v1412_v54 }
 0x1ca   : > { %v1336_v39 = vpop.trf.xlu2 }
 0x1cb   : > { %1368 = vst.msk [vmem:[%s2311_s11 + $0x170] sm:$0xff] %vm578_vm5, %v1336_v39  ;;  %v1504_v10 = vpop.trf.xlu0 }
 0x1cc   : > { %1552 = vst.msk [vmem:[%s2311_s11 + $0x2f0] sm:$0xff] %vm578_vm5, %v1504_v10 }
 0x1cf   : > { %v1413_v58 = vpop.trf.xlu1 }
 0x1d0   : > { %1461 = vst.msk [vmem:[%s2311_s11 + $0x238] sm:$0xff] %vm578_vm5, %v1413_v58 }
 0x1d2   : > { %v1337_v36 = vpop.trf.xlu2 }
 0x1d3   : > { %1369 = vst.msk [vmem:[%s2311_s11 + $0x178] sm:$0xff] %vm578_vm5, %v1337_v36  ;;  %v1505_v22 = vpop.trf.xlu0 }
 0x1d4   : > { %1553 = vst.msk [vmem:[%s2311_s11 + $0x2f8] sm:$0xff] %vm578_vm5, %v1505_v22 }
 0x1d7   : > { %v1414_v61 = vpop.trf.xlu1 }
 0x1d8   : > { %1462 = vst.msk [vmem:[%s2311_s11 + $0x240] sm:$0xff] %vm578_vm5, %v1414_v61 }
 0x1da   : > { %v1338_v47 = vpop.trf.xlu2 }
 0x1db   : > { %1370 = vst.msk [vmem:[%s2311_s11 + $0x180] sm:$0xff] %vm578_vm5, %v1338_v47  ;;  %v1506_v49 = vpop.trf.xlu0 }
 0x1dc   : > { %1554 = vst.msk [vmem:[%s2311_s11 + $0x300] sm:$0xff] %vm578_vm5, %v1506_v49 }
 0x1df   : > { %v1415_v23 = vpop.trf.xlu1 }
 0x1e0   : > { %1463 = vst.msk [vmem:[%s2311_s11 + $0x248] sm:$0xff] %vm578_vm5, %v1415_v23 }
 0x1e2   : > { %v1339_v50 = vpop.trf.xlu2 }
 0x1e3   : > { %1371 = vst.msk [vmem:[%s2311_s11 + $0x188] sm:$0xff] %vm578_vm5, %v1339_v50  ;;  %v1507_v20 = vpop.trf.xlu0 }
 0x1e4   : > { %1555 = vst.msk [vmem:[%s2311_s11 + $0x308] sm:$0xff] %vm578_vm5, %v1507_v20 }
 0x1e7   : > { %v1416_v1 = vpop.trf.xlu1 }
 0x1e8   : > { %1464 = vst.msk [vmem:[%s2311_s11 + $0x250] sm:$0xff] %vm578_vm5, %v1416_v1 }
 0x1ea   : > { %v1340_v53 = vpop.trf.xlu2 }
 0x1eb   : > { %1372 = vst.msk [vmem:[%s2311_s11 + $0x190] sm:$0xff] %vm578_vm5, %v1340_v53  ;;  %v1508_v24 = vpop.trf.xlu0 }
 0x1ec   : > { %1556 = vst.msk [vmem:[%s2311_s11 + $0x310] sm:$0xff] %vm578_vm5, %v1508_v24 }
 0x1ef   : > { %v1417_v3 = vpop.trf.xlu1 }
 0x1f0   : > { %1465 = vst.msk [vmem:[%s2311_s11 + $0x258] sm:$0xff] %vm578_vm5, %v1417_v3 }
 0x1f2   : > { %v1341_v57 = vpop.trf.xlu2 }
 0x1f3   : > { %1373 = vst.msk [vmem:[%s2311_s11 + $0x198] sm:$0xff] %vm578_vm5, %v1341_v57  ;;  %v1509_v27 = vpop.trf.xlu0 }
 0x1f4   : > { %1557 = vst.msk [vmem:[%s2311_s11 + $0x318] sm:$0xff] %vm578_vm5, %v1509_v27 }
 0x1f7   : > { %v1418_v37 = vpop.trf.xlu1 }
 0x1f8   : > { %1466 = vst.msk [vmem:[%s2311_s11 + $0x260] sm:$0xff] %vm578_vm5, %v1418_v37 }
 0x1fa   : > { %v1342_v60 = vpop.trf.xlu2 }
 0x1fb   : > { %1374 = vst.msk [vmem:[%s2311_s11 + $0x1a0] sm:$0xff] %vm578_vm5, %v1342_v60  ;;  %v1510_v13 = vpop.trf.xlu0 }
 0x1fc   : > { %1558 = vst.msk [vmem:[%s2311_s11 + $0x320] sm:$0xff] %vm578_vm5, %v1510_v13 }
 0x1ff   : > { %v1419_v9 = vpop.trf.xlu1 }
 0x200   : > { %1467 = vst.msk [vmem:[%s2311_s11 + $0x268] sm:$0xff] %vm578_vm5, %v1419_v9 }
 0x202   : > { %v1343_v63 = vpop.trf.xlu2 }
 0x203   : > { %1375 = vst.msk [vmem:[%s2311_s11 + $0x1a8] sm:$0xff] %vm578_vm5, %v1343_v63  ;;  %v1511_v31 = vpop.trf.xlu0 }
 0x204   : > { %1559 = vst.msk [vmem:[%s2311_s11 + $0x328] sm:$0xff] %vm578_vm5, %v1511_v31 }
 0x207   : > { %v1436_v15 = vpop.trf.xlu1 }
 0x208   : > { %1468 = vst.msk [vmem:[%s2311_s11 + $0x270] sm:$0xff] %vm578_vm5, %v1436_v15 }
 0x20a   : > { %v1344_v0 = vpop.trf.xlu2 }
 0x20b   : > { %1376 = vst.msk [vmem:[%s2311_s11 + $0x1b0] sm:$0xff] %vm578_vm5, %v1344_v0  ;;  %v1512_v33 = vpop.trf.xlu0 }
 0x20c   : > { %1560 = vst.msk [vmem:[%s2311_s11 + $0x330] sm:$0xff] %vm578_vm5, %v1512_v33 }
 0x20f   : > { %v1437_v17 = vpop.trf.xlu1 }
 0x210   : > { %1469 = vst.msk [vmem:[%s2311_s11 + $0x278] sm:$0xff] %vm578_vm5, %v1437_v17 }
 0x212   : > { %v1345_v2 = vpop.trf.xlu2 }
 0x213   : > { %1377 = vst.msk [vmem:[%s2311_s11 + $0x1b8] sm:$0xff] %vm578_vm5, %v1345_v2  ;;  %v1513_v62 = vpop.trf.xlu0 }
 0x214   : > { %1561 = vst.msk [vmem:[%s2311_s11 + $0x338] sm:$0xff] %vm578_vm5, %v1513_v62 }
 0x217   : > { %v1438_v19 = vpop.trf.xlu1 }
 0x218   : > { %1470 = vst.msk [vmem:[%s2311_s11 + $0x280] sm:$0xff] %vm578_vm5, %v1438_v19 }
 0x21a   : > { %v1346_v42 = vpop.trf.xlu2 }
 0x21b   : > { %1378 = vst.msk [vmem:[%s2311_s11 + $0x1c0] sm:$0xff] %vm578_vm5, %v1346_v42  ;;  %v1514_v40 = vpop.trf.xlu0 }
 0x21c   : > { %1562 = vst.msk [vmem:[%s2311_s11 + $0x340] sm:$0xff] %vm578_vm5, %v1514_v40 }
 0x21f   : > { %v1439_v41 = vpop.trf.xlu1 }
 0x220   : > { %1471 = vst.msk [vmem:[%s2311_s11 + $0x288] sm:$0xff] %vm578_vm5, %v1439_v41 }
 0x222   : > { %v1347_v7 = vpop.trf.xlu2 }
 0x223   : > { %1379 = vst.msk [vmem:[%s2311_s11 + $0x1c8] sm:$0xff] %vm578_vm5, %v1347_v7  ;;  %v1515_v44 = vpop.trf.xlu0 }
 0x224   : > { %1563 = vst.msk [vmem:[%s2311_s11 + $0x348] sm:$0xff] %vm578_vm5, %v1515_v44 }
 0x227   : > { %v1440_v26 = vpop.trf.xlu1 }
 0x228   : > { %1472 = vst.msk [vmem:[%s2311_s11 + $0x290] sm:$0xff] %vm578_vm5, %v1440_v26 }
 0x22a   : > { %v1348_v12 = vpop.trf.xlu2 }
 0x22b   : > { %1380 = vst.msk [vmem:[%s2311_s11 + $0x1d0] sm:$0xff] %vm578_vm5, %v1348_v12  ;;  %v1516_v48 = vpop.trf.xlu0 }
 0x22c   : > { %1564 = vst.msk [vmem:[%s2311_s11 + $0x350] sm:$0xff] %vm578_vm5, %v1516_v48 }
 0x22f   : > { %v1441_v28 = vpop.trf.xlu1 }
 0x230   : > { %1473 = vst.msk [vmem:[%s2311_s11 + $0x298] sm:$0xff] %vm578_vm5, %v1441_v28 }
 0x232   : > { %v1349_v16 = vpop.trf.xlu2 }
 0x233   : > { %1381 = vst.msk [vmem:[%s2311_s11 + $0x1d8] sm:$0xff] %vm578_vm5, %v1349_v16  ;;  %v1517_v51 = vpop.trf.xlu0 }
 0x234   : > { %1565 = vst.msk [vmem:[%s2311_s11 + $0x358] sm:$0xff] %vm578_vm5, %v1517_v51 }
 0x237   : > { %v1442_v30 = vpop.trf.xlu1 }
 0x238   : > { %1474 = vst.msk [vmem:[%s2311_s11 + $0x2a0] sm:$0xff] %vm578_vm5, %v1442_v30 }
 0x23a   : > { %v1350_v18 = vpop.trf.xlu2 }
 0x23b   : > { %1382 = vst.msk [vmem:[%s2311_s11 + $0x1e0] sm:$0xff] %vm578_vm5, %v1350_v18  ;;  %v1518_v54 = vpop.trf.xlu0 }
 0x23c   : > { %1566 = vst.msk [vmem:[%s2311_s11 + $0x360] sm:$0xff] %vm578_vm5, %v1518_v54 }
 0x23f   : > { %v1443_v8 = vpop.trf.xlu1 }
 0x240   : > { %1475 = vst.msk [vmem:[%s2311_s11 + $0x2a8] sm:$0xff] %vm578_vm5, %v1443_v8 }
 0x242   : > { %v1351_v21 = vpop.trf.xlu2 }
 0x243   : > { %1383 = vst.msk [vmem:[%s2311_s11 + $0x1e8] sm:$0xff] %vm578_vm5, %v1351_v21  ;;  %v1519_v58 = vpop.trf.xlu0 }
 0x244   : > { %1567 = vst.msk [vmem:[%s2311_s11 + $0x368] sm:$0xff] %vm578_vm5, %v1519_v58 }
 0x247   : > { %v1444_v35 = vpop.trf.xlu1 }
 0x248   : > { %1476 = vst.msk [vmem:[%s2311_s11 + $0x2b0] sm:$0xff] %vm578_vm5, %v1444_v35 }
 0x24a   : > { %v1536_v25 = vpop.trf.xlu2 }
 0x24b   : > { %1568 = vst.msk [vmem:[%s2311_s11 + $0x370] sm:$0xff] %vm578_vm5, %v1536_v25 }
 0x24f   : > { %v1445_v39 = vpop.trf.xlu1 }
 0x250   : > { %1477 = vst.msk [vmem:[%s2311_s11 + $0x2b8] sm:$0xff] %vm578_vm5, %v1445_v39 }
 0x252   : > { %v1537_v56 = vpop.trf.xlu2 }
 0x253   : > { %1569 = vst.msk [vmem:[%s2311_s11 + $0x378] sm:$0xff] %vm578_vm5, %v1537_v56 }
 0x257   : > { %v1446_v36 = vpop.trf.xlu1 }
 0x258   : > { %1478 = vst.msk [vmem:[%s2311_s11 + $0x2c0] sm:$0xff] %vm578_vm5, %v1446_v36 }
 0x25a   : > { %v1538_v14 = vpop.trf.xlu2 }
 0x25b   : > { %1570 = vst.msk [vmem:[%s2311_s11 + $0x380] sm:$0xff] %vm578_vm5, %v1538_v14 }
 0x25f   : > { %v1447_v47 = vpop.trf.xlu1 }
 0x260   : > { %1479 = vst.msk [vmem:[%s2311_s11 + $0x2c8] sm:$0xff] %vm578_vm5, %v1447_v47 }
 0x262   : > { %v1539_v32 = vpop.trf.xlu2 }
 0x263   : > { %1571 = vst.msk [vmem:[%s2311_s11 + $0x388] sm:$0xff] %vm578_vm5, %v1539_v32 }
 0x267   : > { %v1448_v50 = vpop.trf.xlu1 }
 0x268   : > { %1480 = vst.msk [vmem:[%s2311_s11 + $0x2d0] sm:$0xff] %vm578_vm5, %v1448_v50 }
 0x26a   : > { %v1540_v34 = vpop.trf.xlu2 }
 0x26b   : > { %1572 = vst.msk [vmem:[%s2311_s11 + $0x390] sm:$0xff] %vm578_vm5, %v1540_v34 }
 0x26f   : > { %v1449_v53 = vpop.trf.xlu1 }
 0x270   : > { %1481 = vst.msk [vmem:[%s2311_s11 + $0x2d8] sm:$0xff] %vm578_vm5, %v1449_v53 }
 0x272   : > { %v1541_v38 = vpop.trf.xlu2 }
 0x273   : > { %1573 = vst.msk [vmem:[%s2311_s11 + $0x398] sm:$0xff] %vm578_vm5, %v1541_v38 }
 0x277   : > { %v1450_v57 = vpop.trf.xlu1 }
 0x278   : > { %1482 = vst.msk [vmem:[%s2311_s11 + $0x2e0] sm:$0xff] %vm578_vm5, %v1450_v57 }
 0x27a   : > { %v1542_v43 = vpop.trf.xlu2 }
 0x27b   : > { %1574 = vst.msk [vmem:[%s2311_s11 + $0x3a0] sm:$0xff] %vm578_vm5, %v1542_v43 }
 0x27f   : > { %v1451_v60 = vpop.trf.xlu1 }
 0x280   : > { %1483 = vst.msk [vmem:[%s2311_s11 + $0x2e8] sm:$0xff] %vm578_vm5, %v1451_v60 }
 0x282   : > { %v1543_v45 = vpop.trf.xlu2 }
 0x283   : > { %1575 = vst.msk [vmem:[%s2311_s11 + $0x3a8] sm:$0xff] %vm578_vm5, %v1543_v45 }
 0x28a   : > { %v1544_v29 = vpop.trf.xlu2 }
 0x28b   : > { %1576 = vst.msk [vmem:[%s2311_s11 + $0x3b0] sm:$0xff] %vm578_vm5, %v1544_v29 }
 0x292   : > { %v1545_v52 = vpop.trf.xlu2 }
 0x293   : > { %1577 = vst.msk [vmem:[%s2311_s11 + $0x3b8] sm:$0xff] %vm578_vm5, %v1545_v52 }
 0x29a   : > { %v1546_v55 = vpop.trf.xlu2 }
 0x29b   : > { %1578 = vst.msk [vmem:[%s2311_s11 + $0x3c0] sm:$0xff] %vm578_vm5, %v1546_v55 }
 0x2a2   : > { %v1547_v59 = vpop.trf.xlu2 }
 0x2a3   : > { %1579 = vst.msk [vmem:[%s2311_s11 + $0x3c8] sm:$0xff] %vm578_vm5, %v1547_v59 }
 0x2aa   : > { %v1548_v61 = vpop.trf.xlu2 }
 0x2ab   : > { %1580 = vst.msk [vmem:[%s2311_s11 + $0x3d0] sm:$0xff] %vm578_vm5, %v1548_v61 }
 0x2b2   : > { %v1549_v46 = vpop.trf.xlu2 }
 0x2b3   : > { %1581 = vst.msk [vmem:[%s2311_s11 + $0x3d8] sm:$0xff] %vm578_vm5, %v1549_v46 }
 0x2ba   : > { %v1550_v63 = vpop.trf.xlu2 }
 0x2bb   : > { %1582 = vst.msk [vmem:[%s2311_s11 + $0x3e0] sm:$0xff] %vm578_vm5, %v1550_v63 }
 0x2c2   : > { %v1551_v23 = vpop.trf.xlu2 }
 0x2c3   : > { %1583 = vst.msk [vmem:[%s2311_s11 + $0x3e8] sm:$0xff] %vm578_vm5, %v1551_v23 }
 0x2c4 PF: > { %s19_s30 = sadd.s32 1, %s1840_s30  }
 0x2c5   : > { %p16_p4 = scmp.ge.s32.totalorder %s19_s30, 4  }
 0x2c7   :  { %18 = sbr.rel (!%p16_p4) target bundleno = 1 (0x1), region = 93 }

</bundles_post_ra>
